<compile_context>
chip_gen: v6e
topology: v6e:2x2x1
jax: 0.10.0
libtpu: 0.0.40
codegen_flags: <defaults>
</compile_context>

<pallas_src>
import functools
import math

import jax
import jax.numpy as jnp
from jax.experimental import pallas as pl
from jax.experimental.pallas import tpu as pltpu


class LSTMStateTuple:
    def __init__(self, h, c):
        self.h = h
        self.c = c


def _round_up(x, m):
    return (x + m - 1) // m * m


def _sigmoid(x):
    # sigmoid(x) == 0.5 * tanh(0.5 * x) + 0.5 (exact): 1 EUP op per gate
    # instead of exp + reciprocal -- the per-step body is EUP-bound once the
    # MXU is properly fed.
    return 0.5 * jnp.tanh(0.5 * x) + 0.5


# ---------------------------------------------------------------------------
# Kernel: one grid step = TT timesteps for one batch tile (time-major layout).
# ---------------------------------------------------------------------------
def _lstm_chunk_kernel(x_ref, wih_ref, whh_ref, b_ref, h0_ref, c0_ref,   # in
                       out_ref, h_last_ref, c_last_ref,                  # out
                       p_scr, h_scr, c_scr):                             # scratch
    # x_ref   : (TT, TB, IN)  input chunk
    # wih_ref : (IN, 4H)      W_ih^T, compute dtype (resident across grid)
    # whh_ref : (H, 4H)       W_hh^T, compute dtype (resident across grid)
    # b_ref   : (1, 4H)       fused bias b_ih + b_hh, f32 (resident)
    # h0/c0   : (TB, H)       initial state of this batch tile
    # out_ref : (TT, TB, H)   hidden states of this chunk
    # h_last/c_last : (TB, H) final state, written on the last chunk only
    # p_scr   : (TT, TB, 4H)  f32, chunk's hoisted input projection
    # h_scr/c_scr : (TB, H)   f32, state carried across chunks
    tc = pl.program_id(1)
    TT, TB, IN = x_ref.shape
    H = h_scr.shape[1]

    # (Re)initialize the carried state at the start of each batch tile's sweep.
    @pl.when(tc == 0)
    def _():
        h_scr[...] = h0_ref[...].astype(jnp.float32)
        c_scr[...] = c0_ref[...].astype(jnp.float32)

    # Hoisted input projection: one MXU matmul over the whole chunk's TT*TB
    # rows (off the serial critical path), fused bias included.
    x2d = x_ref[...].reshape(TT * TB, IN).astype(wih_ref.dtype)
    p = jnp.dot(x2d, wih_ref[...], preferred_element_type=jnp.float32)
    p_scr[...] = (p + b_ref[...]).reshape(TT, TB, 4 * H)

    # Serial recurrence over the chunk, fully unrolled. h/c stay in vregs
    # (TB=8..128, H=128 -> small); only p_scr[t] load, the W_hh^T feed to the
    # MXU and the (TB, H) hidden store touch memory each step.
    whh = whh_ref[...]
    h = h_scr[...]
    c = c_scr[...]
    for t in range(TT):
        g = jnp.dot(h.astype(whh.dtype), whh,
                    preferred_element_type=jnp.float32) + p_scr[t]
        # PyTorch gate order i, f, g, o; H multiple of 128 -> lane-aligned.
        i_g = _sigmoid(g[:, 0 * H:1 * H])
        f_g = _sigmoid(g[:, 1 * H:2 * H])
        g_g = jnp.tanh(g[:, 2 * H:3 * H])
        o_g = _sigmoid(g[:, 3 * H:4 * H])
        c = f_g * c + i_g * g_g
        h = o_g * jnp.tanh(c)
        out_ref[t] = h.astype(out_ref.dtype)

    # Carry state across chunks.
    h_scr[...] = h
    c_scr[...] = c

    # Final (h, c) written once, on the last time-chunk of this batch tile.
    @pl.when(tc == pl.num_programs(1) - 1)
    def _():
        h_last_ref[...] = h.astype(h_last_ref.dtype)
        c_last_ref[...] = c.astype(c_last_ref.dtype)


# ---------------------------------------------------------------------------
# pallas_call wrapper
# ---------------------------------------------------------------------------
@functools.partial(jax.jit, static_argnames=("batch_tile", "time_tile"))
def _lstm_seq_call(x, h0, c0, w_ih_t, w_hh_t, b, *, batch_tile, time_tile):
    B, T, IN = x.shape
    H = h0.shape[-1]
    TB, TT = batch_tile, time_tile
    Bp = _round_up(B, TB)

    # Pad batch to the tile (no silent row dropping); padded rows are sliced
    # away after the call.
    if Bp != B:
        x = jnp.pad(x, ((0, Bp - B), (0, 0), (0, 0)))
        h0 = jnp.pad(h0, ((0, Bp - B), (0, 0)))
        c0 = jnp.pad(c0, ((0, Bp - B), (0, 0)))

    # Time-major so every per-chunk / per-step slab is a contiguous lane-dense
    # (TB, *) tile inside the kernel (keeps sublane gathers off the serial
    # path). The two wrapper transposes cost far less than the recurrence.
    x_tm = jnp.transpose(x, (1, 0, 2))  # (T, Bp, IN)

    out_tm, h_last, c_last = pl.pallas_call(
        _lstm_chunk_kernel,
        out_shape=(
            jax.ShapeDtypeStruct((T, Bp, H), x.dtype),   # per-step hidden
            jax.ShapeDtypeStruct((Bp, H), x.dtype),      # final h
            jax.ShapeDtypeStruct((Bp, H), x.dtype),      # final c
        ),
        grid_spec=pltpu.PrefetchScalarGridSpec(
            num_scalar_prefetch=0,
            grid=(Bp // TB, T // TT),
            in_specs=[
                # input chunk for (batch tile, time chunk)
                pl.BlockSpec((TT, TB, IN), lambda bt, tc: (tc, bt, 0)),
                # weights / fused bias: constant index maps -> fetched once,
                # resident in VMEM for the whole grid
                pl.BlockSpec((IN, 4 * H), lambda bt, tc: (0, 0)),
                pl.BlockSpec((H, 4 * H), lambda bt, tc: (0, 0)),
                pl.BlockSpec((1, 4 * H), lambda bt, tc: (0, 0)),
                # initial state for this batch tile
                pl.BlockSpec((TB, H), lambda bt, tc: (bt, 0)),
                pl.BlockSpec((TB, H), lambda bt, tc: (bt, 0)),
            ],
            out_specs=(
                pl.BlockSpec((TT, TB, H), lambda bt, tc: (tc, bt, 0)),
                pl.BlockSpec((TB, H), lambda bt, tc: (bt, 0)),
                pl.BlockSpec((TB, H), lambda bt, tc: (bt, 0)),
            ),
            scratch_shapes=[
                pltpu.VMEM((TT, TB, 4 * H), jnp.float32),  # input projection
                pltpu.VMEM((TB, H), jnp.float32),          # carried h
                pltpu.VMEM((TB, H), jnp.float32),          # carried c
            ],
        ),
        compiler_params=pltpu.CompilerParams(
            dimension_semantics=("parallel", "arbitrary")),
    )(x_tm, w_ih_t, w_hh_t, b, h0, c0)

    out = jnp.transpose(out_tm, (1, 0, 2))
    if Bp != B:
        out, h_last, c_last = out[:B], h_last[:B], c_last[:B]
    return out, h_last, c_last


# ---------------------------------------------------------------------------
# Parameters (mirroring nn.LSTM single-layer) + one-time prep + forward
# ---------------------------------------------------------------------------
def init_lstm_params(key, input_size, hidden_size, dtype=jnp.float32):
    k = 1.0 / math.sqrt(hidden_size)
    k1, k2, k3, k4 = jax.random.split(key, 4)
    return dict(
        w_ih=jax.random.uniform(k1, (4 * hidden_size, input_size), dtype, -k, k),
        w_hh=jax.random.uniform(k2, (4 * hidden_size, hidden_size), dtype, -k, k),
        b_ih=jax.random.uniform(k3, (4 * hidden_size,), dtype, -k, k),
        b_hh=jax.random.uniform(k4, (4 * hidden_size,), dtype, -k, k),
    )


def prepare_lstm_params(params, *, compute_dtype=jnp.bfloat16):
    """One-time prep hoisted out of the per-call path: pre-transposed weights
    in the MXU compute dtype (bf16 by default) and the fused f32 bias."""
    H = params["w_hh"].shape[1]
    if H % 128 != 0:
        # TODO(synk): pad each of the 4 gate blocks to a multiple of 128 lanes
        # to support arbitrary hidden sizes; only lane-aligned H handled here.
        raise ValueError("hidden_size must be a multiple of 128")
    return dict(
        w_ih_t=params["w_ih"].T.astype(compute_dtype),   # (IN, 4H)
        w_hh_t=params["w_hh"].T.astype(compute_dtype),   # (H, 4H)
        b=(params["b_ih"] + params["b_hh"]).astype(jnp.float32).reshape(1, -1),
        hidden=H,
    )


def _choose_tiles(B, T, batch_tile, time_tile):
    if batch_tile is None:
        batch_tile = min(128, _round_up(B, 8))   # fill MXU M dim (<=128 rows)
    TB = _round_up(min(batch_tile, _round_up(B, 8)), 8)
    tt = max(1, min(time_tile, T))
    while T % tt:                                 # largest divisor of T <= tt
        tt -= 1
    return TB, tt


def lstm_forward(prepared, x, state=None, *, batch_tile=None, time_tile=8):
    """Equivalent of LSTM.forward (batch_first). x: (B, T, input_size)."""
    B, T, _ = x.shape
    H = prepared["hidden"]
    if state is None:
        h0 = jnp.zeros((B, H), x.dtype)
        c0 = jnp.zeros((B, H), x.dtype)
    else:
        h0, c0 = (state.h, state.c) if isinstance(state, LSTMStateTuple) else state
        if h0.ndim == 3:   # accept PyTorch-style (num_layers=1, B, H)
            h0, c0 = h0[0], c0[0]
    TB, TT = _choose_tiles(B, T, batch_tile, time_tile)
    out, h_last, c_last = _lstm_seq_call(
        x, h0.astype(x.dtype), c0.astype(x.dtype),
        prepared["w_ih_t"], prepared["w_hh_t"], prepared["b"],
        batch_tile=TB, time_tile=TT)
    return out, LSTMStateTuple(h_last, c_last)


# ---------------------------------------------------------------------------
# Pure-JAX reference (high precision) for correctness checking
# ---------------------------------------------------------------------------
def _reference(params, x, h0, c0):
    H = params["w_hh"].shape[1]
    w_ih_t = params["w_ih"].T
    w_hh_t = params["w_hh"].T
    bias = params["b_ih"] + params["b_hh"]
    hi = jax.lax.Precision.HIGHEST

    def step(carry, x_t):
        h, c = carry
        gates = (jnp.dot(x_t, w_ih_t, precision=hi)
                 + jnp.dot(h, w_hh_t, precision=hi) + bias)
        i = jax.nn.sigmoid(gates[:, :H])
        f = jax.nn.sigmoid(gates[:, H:2 * H])
        g = jnp.tanh(gates[:, 2 * H:3 * H])
        o = jax.nn.sigmoid(gates[:, 3 * H:])
        c_new = f * c + i * g
        h_new = o * jnp.tanh(c_new)
        return (h_new, c_new), h_new

    (hT, cT), out_tm = jax.lax.scan(step, (h0, c0), jnp.transpose(x, (1, 0, 2)))
    return jnp.transpose(out_tm, (1, 0, 2)), hT, cT


if __name__ == "__main__":
    B, T, INPUT, HIDDEN = 8, 16, 32, 128   # H multiple of 128 -> lane-aligned gates

    key = jax.random.PRNGKey(0)
    kp, kx, kh, kc = jax.random.split(key, 4)
    params = init_lstm_params(kp, INPUT, HIDDEN)
    prepared = prepare_lstm_params(params)

    x = jax.random.normal(kx, (B, T, INPUT), jnp.float32)
    h0 = jax.random.normal(kh, (B, HIDDEN), jnp.float32)
    c0 = jax.random.normal(kc, (B, HIDDEN), jnp.float32)

    # With explicit initial state.
    out, st = lstm_forward(prepared, x, LSTMStateTuple(h0, c0))
    jax.block_until_ready(out)
    jax.block_until_ready(st.h)
    jax.block_until_ready(st.c)

    # With state=None (zero init), the PyTorch default path.
    out0, st0 = lstm_forward(prepared, x, None)
    jax.block_until_ready(out0)

    # Ragged shapes (exercise batch padding + time-tile selection): B=5 -> 8, T=12 -> TT=6.
    x_r = jax.random.normal(kx, (5, 12, INPUT), jnp.float32)
    out_r, st_r = lstm_forward(prepared, x_r, None)
    jax.block_until_ready(out_r)

    # Correctness vs pure-JAX f32 HIGHEST reference. Kernel matmuls run in
    # bf16 with f32 accumulation, so tolerances are relaxed accordingly.
    TOL = dict(atol=3e-2, rtol=3e-2)
    ref_out, ref_h, ref_c = _reference(params, x, h0, c0)
    assert jnp.allclose(out, ref_out, **TOL)
    assert jnp.allclose(st.h, ref_h, **TOL)
    assert jnp.allclose(st.c, ref_c, **TOL)

    ref_out0, ref_h0, ref_c0 = _reference(params, x,
                                          jnp.zeros_like(h0), jnp.zeros_like(c0))
    assert jnp.allclose(out0, ref_out0, **TOL)
    assert jnp.allclose(st0.h, ref_h0, **TOL)
    assert jnp.allclose(st0.c, ref_c0, **TOL)

    z5 = jnp.zeros((5, HIDDEN), jnp.float32)
    ref_out_r, ref_h_r, ref_c_r = _reference(params, x_r, z5, z5)
    assert jnp.allclose(out_r, ref_out_r, **TOL)
    assert jnp.allclose(st_r.h, ref_h_r, **TOL)
    assert jnp.allclose(st_r.c, ref_c_r, **TOL)

    print("KERNEL_OK")
</pallas_src>

<mosaic_0001>
module attributes {stable_mosaic.version = 11 : i64} {
  func.func @_lstm_chunk_kernel(%arg0: i32, %arg1: i32, %arg2: memref<8x8x32xf32, #tpu.memory_space<vmem>>, %arg3: memref<32x512xbf16, #tpu.memory_space<vmem>>, %arg4: memref<128x512xbf16, #tpu.memory_space<vmem>>, %arg5: memref<1x512xf32, #tpu.memory_space<vmem>>, %arg6: memref<8x128xf32, #tpu.memory_space<vmem>>, %arg7: memref<8x128xf32, #tpu.memory_space<vmem>>, %arg8: memref<8x8x128xf32, #tpu.memory_space<vmem>>, %arg9: memref<8x128xf32, #tpu.memory_space<vmem>>, %arg10: memref<8x128xf32, #tpu.memory_space<vmem>>, %arg11: memref<8x8x512xf32, #tpu.memory_space<vmem>>, %arg12: memref<8x128xf32, #tpu.memory_space<vmem>>, %arg13: memref<8x128xf32, #tpu.memory_space<vmem>>) attributes {dimension_semantics = [#tpu.dimension_semantics<parallel>, #tpu.dimension_semantics<arbitrary>], iteration_bounds = array<i64: 1, 2>, scalar_prefetch = 0 : i64, scratch_operands = 3 : i64, tpu.core_type = #tpu.core_type<tc>, window_params = [{transform_indices = @transform_0, window_bounds = array<i64: 8, 8, 32>}, {pipeline_mode = #tpu.pipeline_mode<synchronous>, transform_indices = @transform_1, window_bounds = array<i64: 32, 512>}, {pipeline_mode = #tpu.pipeline_mode<synchronous>, transform_indices = @transform_2, window_bounds = array<i64: 128, 512>}, {pipeline_mode = #tpu.pipeline_mode<synchronous>, transform_indices = @transform_3, window_bounds = array<i64: 1, 512>}, {transform_indices = @transform_4, window_bounds = array<i64: 8, 128>}, {transform_indices = @transform_5, window_bounds = array<i64: 8, 128>}, {transform_indices = @transform_6, window_bounds = array<i64: 8, 8, 128>}, {transform_indices = @transform_7, window_bounds = array<i64: 8, 128>}, {transform_indices = @transform_8, window_bounds = array<i64: 8, 128>}]} {
    %c0_i32 = arith.constant 0 : i32
    %0 = arith.cmpi eq, %arg1, %c0_i32 : i32
    %1 = arith.extui %0 : i1 to i32
    %c0_i32_0 = arith.constant 0 : i32
    %2 = arith.cmpi ne, %1, %c0_i32_0 : i32
    scf.if %2 {
      %c0_142 = arith.constant 0 : index
      %c0_143 = arith.constant 0 : index
      %333 = vector.load %arg6[%c0_142, %c0_143] : memref<8x128xf32, #tpu.memory_space<vmem>>, vector<8x128xf32>
      %c0_144 = arith.constant 0 : index
      %c0_145 = arith.constant 0 : index
      %334 = vector.load %arg12[%c0_144, %c0_145] : memref<8x128xf32, #tpu.memory_space<vmem>>, vector<8x128xf32>
      tpu.vector_store %arg12[%c0_144, %c0_145], %333 {strides = array<i32>} : memref<8x128xf32, #tpu.memory_space<vmem>>, vector<8x128xf32>,
      %c0_146 = arith.constant 0 : index
      %c0_147 = arith.constant 0 : index
      %335 = vector.load %arg7[%c0_146, %c0_147] : memref<8x128xf32, #tpu.memory_space<vmem>>, vector<8x128xf32>
      %c0_148 = arith.constant 0 : index
      %c0_149 = arith.constant 0 : index
      %336 = vector.load %arg13[%c0_148, %c0_149] : memref<8x128xf32, #tpu.memory_space<vmem>>, vector<8x128xf32>
      tpu.vector_store %arg13[%c0_148, %c0_149], %335 {strides = array<i32>} : memref<8x128xf32, #tpu.memory_space<vmem>>, vector<8x128xf32>,
    } else {
    }
    %c0 = arith.constant 0 : index
    %c0_1 = arith.constant 0 : index
    %c0_2 = arith.constant 0 : index
    %3 = vector.load %arg2[%c0, %c0_1, %c0_2] : memref<8x8x32xf32, #tpu.memory_space<vmem>>, vector<8x8x32xf32>
    %4 = vector.shape_cast %3 : vector<8x8x32xf32> to vector<64x32xf32>
    %5 = arith.truncf %4 : vector<64x32xf32> to vector<64x32xbf16>
    %c0_3 = arith.constant 0 : index
    %c0_4 = arith.constant 0 : index
    %6 = vector.load %arg3[%c0_3, %c0_4] : memref<32x512xbf16, #tpu.memory_space<vmem>>, vector<32x512xbf16>
    %cst = arith.constant dense<0.000000e+00> : vector<64x512xf32>
    %7 = tpu.matmul %5, %6, %cst {dimension_numbers = #tpu.dot_dimension_numbers<[1], [0], [0], [1], [0, 0, 1, 1], [], []>} : vector<64x32xbf16>, vector<32x512xbf16>, vector<64x512xf32> -> vector<64x512xf32>
    %c0_5 = arith.constant 0 : index
    %c0_6 = arith.constant 0 : index
    %8 = vector.load %arg5[%c0_5, %c0_6] : memref<1x512xf32, #tpu.memory_space<vmem>>, vector<1x512xf32>
    %9 = vector.broadcast %8 : vector<1x512xf32> to vector<64x512xf32>
    %10 = arith.addf %7, %9 : vector<64x512xf32>
    %11 = vector.shape_cast %10 : vector<64x512xf32> to vector<8x8x512xf32>
    %c0_7 = arith.constant 0 : index
    %c0_8 = arith.constant 0 : index
    %c0_9 = arith.constant 0 : index
    %12 = vector.load %arg11[%c0_7, %c0_8, %c0_9] : memref<8x8x512xf32, #tpu.memory_space<vmem>>, vector<8x8x512xf32>
    tpu.vector_store %arg11[%c0_7, %c0_8, %c0_9], %11 {strides = array<i32>} : memref<8x8x512xf32, #tpu.memory_space<vmem>>, vector<8x8x512xf32>,
    %c0_10 = arith.constant 0 : index
    %c0_11 = arith.constant 0 : index
    %13 = vector.load %arg4[%c0_10, %c0_11] : memref<128x512xbf16, #tpu.memory_space<vmem>>, vector<128x512xbf16>
    %c0_12 = arith.constant 0 : index
    %c0_13 = arith.constant 0 : index
    %14 = vector.load %arg12[%c0_12, %c0_13] : memref<8x128xf32, #tpu.memory_space<vmem>>, vector<8x128xf32>
    %c0_14 = arith.constant 0 : index
    %c0_15 = arith.constant 0 : index
    %15 = vector.load %arg13[%c0_14, %c0_15] : memref<8x128xf32, #tpu.memory_space<vmem>>, vector<8x128xf32>
    %16 = arith.truncf %14 : vector<8x128xf32> to vector<8x128xbf16>
    %cst_16 = arith.constant dense<0.000000e+00> : vector<8x512xf32>
    %17 = tpu.matmul %16, %13, %cst_16 {dimension_numbers = #tpu.dot_dimension_numbers<[1], [0], [0], [1], [0, 0, 1, 1], [], []>} : vector<8x128xbf16>, vector<128x512xbf16>, vector<8x512xf32> -> vector<8x512xf32>
    %c0_17 = arith.constant 0 : index
    %c0_18 = arith.constant 0 : index
    %c0_19 = arith.constant 0 : index
    %18 = vector.load %arg11[%c0_17, %c0_18, %c0_19] : memref<8x8x512xf32, #tpu.memory_space<vmem>>, vector<1x8x512xf32>
    %19 = vector.shape_cast %18 : vector<1x8x512xf32> to vector<8x512xf32>
    %20 = arith.addf %17, %19 : vector<8x512xf32>
    %21 = vector.extract_strided_slice %20 {offsets = [0, 0], sizes = [8, 128], strides = [1, 1]} : vector<8x512xf32> to vector<8x128xf32>
    %cst_20 = arith.constant 5.000000e-01 : f32
    %22 = vector.broadcast %cst_20 : f32 to vector<8x128xf32>
    %23 = arith.mulf %22, %21 : vector<8x128xf32>
    %24 = math.tanh %23 : vector<8x128xf32>
    %cst_21 = arith.constant 5.000000e-01 : f32
    %25 = vector.broadcast %cst_21 : f32 to vector<8x128xf32>
    %26 = arith.mulf %25, %24 : vector<8x128xf32>
    %cst_22 = arith.constant 5.000000e-01 : f32
    %27 = vector.broadcast %cst_22 : f32 to vector<8x128xf32>
    %28 = arith.addf %26, %27 : vector<8x128xf32>
    %29 = vector.extract_strided_slice %20 {offsets = [0, 128], sizes = [8, 128], strides = [1, 1]} : vector<8x512xf32> to vector<8x128xf32>
    %cst_23 = arith.constant 5.000000e-01 : f32
    %30 = vector.broadcast %cst_23 : f32 to vector<8x128xf32>
    %31 = arith.mulf %30, %29 : vector<8x128xf32>
    %32 = math.tanh %31 : vector<8x128xf32>
    %cst_24 = arith.constant 5.000000e-01 : f32
    %33 = vector.broadcast %cst_24 : f32 to vector<8x128xf32>
    %34 = arith.mulf %33, %32 : vector<8x128xf32>
    %cst_25 = arith.constant 5.000000e-01 : f32
    %35 = vector.broadcast %cst_25 : f32 to vector<8x128xf32>
    %36 = arith.addf %34, %35 : vector<8x128xf32>
    %37 = vector.extract_strided_slice %20 {offsets = [0, 256], sizes = [8, 128], strides = [1, 1]} : vector<8x512xf32> to vector<8x128xf32>
    %38 = math.tanh %37 : vector<8x128xf32>
    %39 = vector.extract_strided_slice %20 {offsets = [0, 384], sizes = [8, 128], strides = [1, 1]} : vector<8x512xf32> to vector<8x128xf32>
    %cst_26 = arith.constant 5.000000e-01 : f32
    %40 = vector.broadcast %cst_26 : f32 to vector<8x128xf32>
    %41 = arith.mulf %40, %39 : vector<8x128xf32>
    %42 = math.tanh %41 : vector<8x128xf32>
    %cst_27 = arith.constant 5.000000e-01 : f32
    %43 = vector.broadcast %cst_27 : f32 to vector<8x128xf32>
    %44 = arith.mulf %43, %42 : vector<8x128xf32>
    %cst_28 = arith.constant 5.000000e-01 : f32
    %45 = vector.broadcast %cst_28 : f32 to vector<8x128xf32>
    %46 = arith.addf %44, %45 : vector<8x128xf32>
    %47 = arith.mulf %36, %15 : vector<8x128xf32>
    %48 = arith.mulf %28, %38 : vector<8x128xf32>
    %49 = arith.addf %47, %48 : vector<8x128xf32>
    %50 = math.tanh %49 : vector<8x128xf32>
    %51 = arith.mulf %46, %50 : vector<8x128xf32>
    %c0_29 = arith.constant 0 : index
    %c0_30 = arith.constant 0 : index
    %c0_31 = arith.constant 0 : index
    %52 = vector.load %arg8[%c0_29, %c0_30, %c0_31] : memref<8x8x128xf32, #tpu.memory_space<vmem>>, vector<1x8x128xf32>
    %53 = vector.shape_cast %52 : vector<1x8x128xf32> to vector<8x128xf32>
    %54 = vector.shape_cast %51 : vector<8x128xf32> to vector<1x8x128xf32>
    tpu.vector_store %arg8[%c0_29, %c0_30, %c0_31], %54 {strides = array<i32>} : memref<8x8x128xf32, #tpu.memory_space<vmem>>, vector<1x8x128xf32>,
    %55 = arith.truncf %51 : vector<8x128xf32> to vector<8x128xbf16>
    %cst_32 = arith.constant dense<0.000000e+00> : vector<8x512xf32>
    %56 = tpu.matmul %55, %13, %cst_32 {dimension_numbers = #tpu.dot_dimension_numbers<[1], [0], [0], [1], [0, 0, 1, 1], [], []>} : vector<8x128xbf16>, vector<128x512xbf16>, vector<8x512xf32> -> vector<8x512xf32>
    %c1 = arith.constant 1 : index
    %c0_33 = arith.constant 0 : index
    %c0_34 = arith.constant 0 : index
    %57 = vector.load %arg11[%c1, %c0_33, %c0_34] : memref<8x8x512xf32, #tpu.memory_space<vmem>>, vector<1x8x512xf32>
    %58 = vector.shape_cast %57 : vector<1x8x512xf32> to vector<8x512xf32>
    %59 = arith.addf %56, %58 : vector<8x512xf32>
    %60 = vector.extract_strided_slice %59 {offsets = [0, 0], sizes = [8, 128], strides = [1, 1]} : vector<8x512xf32> to vector<8x128xf32>
    %cst_35 = arith.constant 5.000000e-01 : f32
    %61 = vector.broadcast %cst_35 : f32 to vector<8x128xf32>
    %62 = arith.mulf %61, %60 : vector<8x128xf32>
    %63 = math.tanh %62 : vector<8x128xf32>
    %cst_36 = arith.constant 5.000000e-01 : f32
    %64 = vector.broadcast %cst_36 : f32 to vector<8x128xf32>
    %65 = arith.mulf %64, %63 : vector<8x128xf32>
    %cst_37 = arith.constant 5.000000e-01 : f32
    %66 = vector.broadcast %cst_37 : f32 to vector<8x128xf32>
    %67 = arith.addf %65, %66 : vector<8x128xf32>
    %68 = vector.extract_strided_slice %59 {offsets = [0, 128], sizes = [8, 128], strides = [1, 1]} : vector<8x512xf32> to vector<8x128xf32>
    %cst_38 = arith.constant 5.000000e-01 : f32
    %69 = vector.broadcast %cst_38 : f32 to vector<8x128xf32>
    %70 = arith.mulf %69, %68 : vector<8x128xf32>
    %71 = math.tanh %70 : vector<8x128xf32>
    %cst_39 = arith.constant 5.000000e-01 : f32
    %72 = vector.broadcast %cst_39 : f32 to vector<8x128xf32>
    %73 = arith.mulf %72, %71 : vector<8x128xf32>
    %cst_40 = arith.constant 5.000000e-01 : f32
    %74 = vector.broadcast %cst_40 : f32 to vector<8x128xf32>
    %75 = arith.addf %73, %74 : vector<8x128xf32>
    %76 = vector.extract_strided_slice %59 {offsets = [0, 256], sizes = [8, 128], strides = [1, 1]} : vector<8x512xf32> to vector<8x128xf32>
    %77 = math.tanh %76 : vector<8x128xf32>
    %78 = vector.extract_strided_slice %59 {offsets = [0, 384], sizes = [8, 128], strides = [1, 1]} : vector<8x512xf32> to vector<8x128xf32>
    %cst_41 = arith.constant 5.000000e-01 : f32
    %79 = vector.broadcast %cst_41 : f32 to vector<8x128xf32>
    %80 = arith.mulf %79, %78 : vector<8x128xf32>
    %81 = math.tanh %80 : vector<8x128xf32>
    %cst_42 = arith.constant 5.000000e-01 : f32
    %82 = vector.broadcast %cst_42 : f32 to vector<8x128xf32>
    %83 = arith.mulf %82, %81 : vector<8x128xf32>
    %cst_43 = arith.constant 5.000000e-01 : f32
    %84 = vector.broadcast %cst_43 : f32 to vector<8x128xf32>
    %85 = arith.addf %83, %84 : vector<8x128xf32>
    %86 = arith.mulf %75, %49 : vector<8x128xf32>
    %87 = arith.mulf %67, %77 : vector<8x128xf32>
    %88 = arith.addf %86, %87 : vector<8x128xf32>
    %89 = math.tanh %88 : vector<8x128xf32>
    %90 = arith.mulf %85, %89 : vector<8x128xf32>
    %c1_44 = arith.constant 1 : index
    %c0_45 = arith.constant 0 : index
    %c0_46 = arith.constant 0 : index
    %91 = vector.load %arg8[%c1_44, %c0_45, %c0_46] : memref<8x8x128xf32, #tpu.memory_space<vmem>>, vector<1x8x128xf32>
    %92 = vector.shape_cast %91 : vector<1x8x128xf32> to vector<8x128xf32>
    %93 = vector.shape_cast %90 : vector<8x128xf32> to vector<1x8x128xf32>
    tpu.vector_store %arg8[%c1_44, %c0_45, %c0_46], %93 {strides = array<i32>} : memref<8x8x128xf32, #tpu.memory_space<vmem>>, vector<1x8x128xf32>,
    %94 = arith.truncf %90 : vector<8x128xf32> to vector<8x128xbf16>
    %cst_47 = arith.constant dense<0.000000e+00> : vector<8x512xf32>
    %95 = tpu.matmul %94, %13, %cst_47 {dimension_numbers = #tpu.dot_dimension_numbers<[1], [0], [0], [1], [0, 0, 1, 1], [], []>} : vector<8x128xbf16>, vector<128x512xbf16>, vector<8x512xf32> -> vector<8x512xf32>
    %c2 = arith.constant 2 : index
    %c0_48 = arith.constant 0 : index
    %c0_49 = arith.constant 0 : index
    %96 = vector.load %arg11[%c2, %c0_48, %c0_49] : memref<8x8x512xf32, #tpu.memory_space<vmem>>, vector<1x8x512xf32>
    %97 = vector.shape_cast %96 : vector<1x8x512xf32> to vector<8x512xf32>
    %98 = arith.addf %95, %97 : vector<8x512xf32>
    %99 = vector.extract_strided_slice %98 {offsets = [0, 0], sizes = [8, 128], strides = [1, 1]} : vector<8x512xf32> to vector<8x128xf32>
    %cst_50 = arith.constant 5.000000e-01 : f32
    %100 = vector.broadcast %cst_50 : f32 to vector<8x128xf32>
    %101 = arith.mulf %100, %99 : vector<8x128xf32>
    %102 = math.tanh %101 : vector<8x128xf32>
    %cst_51 = arith.constant 5.000000e-01 : f32
    %103 = vector.broadcast %cst_51 : f32 to vector<8x128xf32>
    %104 = arith.mulf %103, %102 : vector<8x128xf32>
    %cst_52 = arith.constant 5.000000e-01 : f32
    %105 = vector.broadcast %cst_52 : f32 to vector<8x128xf32>
    %106 = arith.addf %104, %105 : vector<8x128xf32>
    %107 = vector.extract_strided_slice %98 {offsets = [0, 128], sizes = [8, 128], strides = [1, 1]} : vector<8x512xf32> to vector<8x128xf32>
    %cst_53 = arith.constant 5.000000e-01 : f32
    %108 = vector.broadcast %cst_53 : f32 to vector<8x128xf32>
    %109 = arith.mulf %108, %107 : vector<8x128xf32>
    %110 = math.tanh %109 : vector<8x128xf32>
    %cst_54 = arith.constant 5.000000e-01 : f32
    %111 = vector.broadcast %cst_54 : f32 to vector<8x128xf32>
    %112 = arith.mulf %111, %110 : vector<8x128xf32>
    %cst_55 = arith.constant 5.000000e-01 : f32
    %113 = vector.broadcast %cst_55 : f32 to vector<8x128xf32>
    %114 = arith.addf %112, %113 : vector<8x128xf32>
    %115 = vector.extract_strided_slice %98 {offsets = [0, 256], sizes = [8, 128], strides = [1, 1]} : vector<8x512xf32> to vector<8x128xf32>
    %116 = math.tanh %115 : vector<8x128xf32>
    %117 = vector.extract_strided_slice %98 {offsets = [0, 384], sizes = [8, 128], strides = [1, 1]} : vector<8x512xf32> to vector<8x128xf32>
    %cst_56 = arith.constant 5.000000e-01 : f32
    %118 = vector.broadcast %cst_56 : f32 to vector<8x128xf32>
    %119 = arith.mulf %118, %117 : vector<8x128xf32>
    %120 = math.tanh %119 : vector<8x128xf32>
    %cst_57 = arith.constant 5.000000e-01 : f32
    %121 = vector.broadcast %cst_57 : f32 to vector<8x128xf32>
    %122 = arith.mulf %121, %120 : vector<8x128xf32>
    %cst_58 = arith.constant 5.000000e-01 : f32
    %123 = vector.broadcast %cst_58 : f32 to vector<8x128xf32>
    %124 = arith.addf %122, %123 : vector<8x128xf32>
    %125 = arith.mulf %114, %88 : vector<8x128xf32>
    %126 = arith.mulf %106, %116 : vector<8x128xf32>
    %127 = arith.addf %125, %126 : vector<8x128xf32>
    %128 = math.tanh %127 : vector<8x128xf32>
    %129 = arith.mulf %124, %128 : vector<8x128xf32>
    %c2_59 = arith.constant 2 : index
    %c0_60 = arith.constant 0 : index
    %c0_61 = arith.constant 0 : index
    %130 = vector.load %arg8[%c2_59, %c0_60, %c0_61] : memref<8x8x128xf32, #tpu.memory_space<vmem>>, vector<1x8x128xf32>
    %131 = vector.shape_cast %130 : vector<1x8x128xf32> to vector<8x128xf32>
    %132 = vector.shape_cast %129 : vector<8x128xf32> to vector<1x8x128xf32>
    tpu.vector_store %arg8[%c2_59, %c0_60, %c0_61], %132 {strides = array<i32>} : memref<8x8x128xf32, #tpu.memory_space<vmem>>, vector<1x8x128xf32>,
    %133 = arith.truncf %129 : vector<8x128xf32> to vector<8x128xbf16>
    %cst_62 = arith.constant dense<0.000000e+00> : vector<8x512xf32>
    %134 = tpu.matmul %133, %13, %cst_62 {dimension_numbers = #tpu.dot_dimension_numbers<[1], [0], [0], [1], [0, 0, 1, 1], [], []>} : vector<8x128xbf16>, vector<128x512xbf16>, vector<8x512xf32> -> vector<8x512xf32>
    %c3 = arith.constant 3 : index
    %c0_63 = arith.constant 0 : index
    %c0_64 = arith.constant 0 : index
    %135 = vector.load %arg11[%c3, %c0_63, %c0_64] : memref<8x8x512xf32, #tpu.memory_space<vmem>>, vector<1x8x512xf32>
    %136 = vector.shape_cast %135 : vector<1x8x512xf32> to vector<8x512xf32>
    %137 = arith.addf %134, %136 : vector<8x512xf32>
    %138 = vector.extract_strided_slice %137 {offsets = [0, 0], sizes = [8, 128], strides = [1, 1]} : vector<8x512xf32> to vector<8x128xf32>
    %cst_65 = arith.constant 5.000000e-01 : f32
    %139 = vector.broadcast %cst_65 : f32 to vector<8x128xf32>
    %140 = arith.mulf %139, %138 : vector<8x128xf32>
    %141 = math.tanh %140 : vector<8x128xf32>
    %cst_66 = arith.constant 5.000000e-01 : f32
    %142 = vector.broadcast %cst_66 : f32 to vector<8x128xf32>
    %143 = arith.mulf %142, %141 : vector<8x128xf32>
    %cst_67 = arith.constant 5.000000e-01 : f32
    %144 = vector.broadcast %cst_67 : f32 to vector<8x128xf32>
    %145 = arith.addf %143, %144 : vector<8x128xf32>
    %146 = vector.extract_strided_slice %137 {offsets = [0, 128], sizes = [8, 128], strides = [1, 1]} : vector<8x512xf32> to vector<8x128xf32>
    %cst_68 = arith.constant 5.000000e-01 : f32
    %147 = vector.broadcast %cst_68 : f32 to vector<8x128xf32>
    %148 = arith.mulf %147, %146 : vector<8x128xf32>
    %149 = math.tanh %148 : vector<8x128xf32>
    %cst_69 = arith.constant 5.000000e-01 : f32
    %150 = vector.broadcast %cst_69 : f32 to vector<8x128xf32>
    %151 = arith.mulf %150, %149 : vector<8x128xf32>
    %cst_70 = arith.constant 5.000000e-01 : f32
    %152 = vector.broadcast %cst_70 : f32 to vector<8x128xf32>
    %153 = arith.addf %151, %152 : vector<8x128xf32>
    %154 = vector.extract_strided_slice %137 {offsets = [0, 256], sizes = [8, 128], strides = [1, 1]} : vector<8x512xf32> to vector<8x128xf32>
    %155 = math.tanh %154 : vector<8x128xf32>
    %156 = vector.extract_strided_slice %137 {offsets = [0, 384], sizes = [8, 128], strides = [1, 1]} : vector<8x512xf32> to vector<8x128xf32>
    %cst_71 = arith.constant 5.000000e-01 : f32
    %157 = vector.broadcast %cst_71 : f32 to vector<8x128xf32>
    %158 = arith.mulf %157, %156 : vector<8x128xf32>
    %159 = math.tanh %158 : vector<8x128xf32>
    %cst_72 = arith.constant 5.000000e-01 : f32
    %160 = vector.broadcast %cst_72 : f32 to vector<8x128xf32>
    %161 = arith.mulf %160, %159 : vector<8x128xf32>
    %cst_73 = arith.constant 5.000000e-01 : f32
    %162 = vector.broadcast %cst_73 : f32 to vector<8x128xf32>
    %163 = arith.addf %161, %162 : vector<8x128xf32>
    %164 = arith.mulf %153, %127 : vector<8x128xf32>
    %165 = arith.mulf %145, %155 : vector<8x128xf32>
    %166 = arith.addf %164, %165 : vector<8x128xf32>
    %167 = math.tanh %166 : vector<8x128xf32>
    %168 = arith.mulf %163, %167 : vector<8x128xf32>
    %c3_74 = arith.constant 3 : index
    %c0_75 = arith.constant 0 : index
    %c0_76 = arith.constant 0 : index
    %169 = vector.load %arg8[%c3_74, %c0_75, %c0_76] : memref<8x8x128xf32, #tpu.memory_space<vmem>>, vector<1x8x128xf32>
    %170 = vector.shape_cast %169 : vector<1x8x128xf32> to vector<8x128xf32>
    %171 = vector.shape_cast %168 : vector<8x128xf32> to vector<1x8x128xf32>
    tpu.vector_store %arg8[%c3_74, %c0_75, %c0_76], %171 {strides = array<i32>} : memref<8x8x128xf32, #tpu.memory_space<vmem>>, vector<1x8x128xf32>,
    %172 = arith.truncf %168 : vector<8x128xf32> to vector<8x128xbf16>
    %cst_77 = arith.constant dense<0.000000e+00> : vector<8x512xf32>
    %173 = tpu.matmul %172, %13, %cst_77 {dimension_numbers = #tpu.dot_dimension_numbers<[1], [0], [0], [1], [0, 0, 1, 1], [], []>} : vector<8x128xbf16>, vector<128x512xbf16>, vector<8x512xf32> -> vector<8x512xf32>
    %c4 = arith.constant 4 : index
    %c0_78 = arith.constant 0 : index
    %c0_79 = arith.constant 0 : index
    %174 = vector.load %arg11[%c4, %c0_78, %c0_79] : memref<8x8x512xf32, #tpu.memory_space<vmem>>, vector<1x8x512xf32>
    %175 = vector.shape_cast %174 : vector<1x8x512xf32> to vector<8x512xf32>
    %176 = arith.addf %173, %175 : vector<8x512xf32>
    %177 = vector.extract_strided_slice %176 {offsets = [0, 0], sizes = [8, 128], strides = [1, 1]} : vector<8x512xf32> to vector<8x128xf32>
    %cst_80 = arith.constant 5.000000e-01 : f32
    %178 = vector.broadcast %cst_80 : f32 to vector<8x128xf32>
    %179 = arith.mulf %178, %177 : vector<8x128xf32>
    %180 = math.tanh %179 : vector<8x128xf32>
    %cst_81 = arith.constant 5.000000e-01 : f32
    %181 = vector.broadcast %cst_81 : f32 to vector<8x128xf32>
    %182 = arith.mulf %181, %180 : vector<8x128xf32>
    %cst_82 = arith.constant 5.000000e-01 : f32
    %183 = vector.broadcast %cst_82 : f32 to vector<8x128xf32>
    %184 = arith.addf %182, %183 : vector<8x128xf32>
    %185 = vector.extract_strided_slice %176 {offsets = [0, 128], sizes = [8, 128], strides = [1, 1]} : vector<8x512xf32> to vector<8x128xf32>
    %cst_83 = arith.constant 5.000000e-01 : f32
    %186 = vector.broadcast %cst_83 : f32 to vector<8x128xf32>
    %187 = arith.mulf %186, %185 : vector<8x128xf32>
    %188 = math.tanh %187 : vector<8x128xf32>
    %cst_84 = arith.constant 5.000000e-01 : f32
    %189 = vector.broadcast %cst_84 : f32 to vector<8x128xf32>
    %190 = arith.mulf %189, %188 : vector<8x128xf32>
    %cst_85 = arith.constant 5.000000e-01 : f32
    %191 = vector.broadcast %cst_85 : f32 to vector<8x128xf32>
    %192 = arith.addf %190, %191 : vector<8x128xf32>
    %193 = vector.extract_strided_slice %176 {offsets = [0, 256], sizes = [8, 128], strides = [1, 1]} : vector<8x512xf32> to vector<8x128xf32>
    %194 = math.tanh %193 : vector<8x128xf32>
    %195 = vector.extract_strided_slice %176 {offsets = [0, 384], sizes = [8, 128], strides = [1, 1]} : vector<8x512xf32> to vector<8x128xf32>
    %cst_86 = arith.constant 5.000000e-01 : f32
    %196 = vector.broadcast %cst_86 : f32 to vector<8x128xf32>
    %197 = arith.mulf %196, %195 : vector<8x128xf32>
    %198 = math.tanh %197 : vector<8x128xf32>
    %cst_87 = arith.constant 5.000000e-01 : f32
    %199 = vector.broadcast %cst_87 : f32 to vector<8x128xf32>
    %200 = arith.mulf %199, %198 : vector<8x128xf32>
    %cst_88 = arith.constant 5.000000e-01 : f32
    %201 = vector.broadcast %cst_88 : f32 to vector<8x128xf32>
    %202 = arith.addf %200, %201 : vector<8x128xf32>
    %203 = arith.mulf %192, %166 : vector<8x128xf32>
    %204 = arith.mulf %184, %194 : vector<8x128xf32>
    %205 = arith.addf %203, %204 : vector<8x128xf32>
    %206 = math.tanh %205 : vector<8x128xf32>
    %207 = arith.mulf %202, %206 : vector<8x128xf32>
    %c4_89 = arith.constant 4 : index
    %c0_90 = arith.constant 0 : index
    %c0_91 = arith.constant 0 : index
    %208 = vector.load %arg8[%c4_89, %c0_90, %c0_91] : memref<8x8x128xf32, #tpu.memory_space<vmem>>, vector<1x8x128xf32>
    %209 = vector.shape_cast %208 : vector<1x8x128xf32> to vector<8x128xf32>
    %210 = vector.shape_cast %207 : vector<8x128xf32> to vector<1x8x128xf32>
    tpu.vector_store %arg8[%c4_89, %c0_90, %c0_91], %210 {strides = array<i32>} : memref<8x8x128xf32, #tpu.memory_space<vmem>>, vector<1x8x128xf32>,
    %211 = arith.truncf %207 : vector<8x128xf32> to vector<8x128xbf16>
    %cst_92 = arith.constant dense<0.000000e+00> : vector<8x512xf32>
    %212 = tpu.matmul %211, %13, %cst_92 {dimension_numbers = #tpu.dot_dimension_numbers<[1], [0], [0], [1], [0, 0, 1, 1], [], []>} : vector<8x128xbf16>, vector<128x512xbf16>, vector<8x512xf32> -> vector<8x512xf32>
    %c5 = arith.constant 5 : index
    %c0_93 = arith.constant 0 : index
    %c0_94 = arith.constant 0 : index
    %213 = vector.load %arg11[%c5, %c0_93, %c0_94] : memref<8x8x512xf32, #tpu.memory_space<vmem>>, vector<1x8x512xf32>
    %214 = vector.shape_cast %213 : vector<1x8x512xf32> to vector<8x512xf32>
    %215 = arith.addf %212, %214 : vector<8x512xf32>
    %216 = vector.extract_strided_slice %215 {offsets = [0, 0], sizes = [8, 128], strides = [1, 1]} : vector<8x512xf32> to vector<8x128xf32>
    %cst_95 = arith.constant 5.000000e-01 : f32
    %217 = vector.broadcast %cst_95 : f32 to vector<8x128xf32>
    %218 = arith.mulf %217, %216 : vector<8x128xf32>
    %219 = math.tanh %218 : vector<8x128xf32>
    %cst_96 = arith.constant 5.000000e-01 : f32
    %220 = vector.broadcast %cst_96 : f32 to vector<8x128xf32>
    %221 = arith.mulf %220, %219 : vector<8x128xf32>
    %cst_97 = arith.constant 5.000000e-01 : f32
    %222 = vector.broadcast %cst_97 : f32 to vector<8x128xf32>
    %223 = arith.addf %221, %222 : vector<8x128xf32>
    %224 = vector.extract_strided_slice %215 {offsets = [0, 128], sizes = [8, 128], strides = [1, 1]} : vector<8x512xf32> to vector<8x128xf32>
    %cst_98 = arith.constant 5.000000e-01 : f32
    %225 = vector.broadcast %cst_98 : f32 to vector<8x128xf32>
    %226 = arith.mulf %225, %224 : vector<8x128xf32>
    %227 = math.tanh %226 : vector<8x128xf32>
    %cst_99 = arith.constant 5.000000e-01 : f32
    %228 = vector.broadcast %cst_99 : f32 to vector<8x128xf32>
    %229 = arith.mulf %228, %227 : vector<8x128xf32>
    %cst_100 = arith.constant 5.000000e-01 : f32
    %230 = vector.broadcast %cst_100 : f32 to vector<8x128xf32>
    %231 = arith.addf %229, %230 : vector<8x128xf32>
    %232 = vector.extract_strided_slice %215 {offsets = [0, 256], sizes = [8, 128], strides = [1, 1]} : vector<8x512xf32> to vector<8x128xf32>
    %233 = math.tanh %232 : vector<8x128xf32>
    %234 = vector.extract_strided_slice %215 {offsets = [0, 384], sizes = [8, 128], strides = [1, 1]} : vector<8x512xf32> to vector<8x128xf32>
    %cst_101 = arith.constant 5.000000e-01 : f32
    %235 = vector.broadcast %cst_101 : f32 to vector<8x128xf32>
    %236 = arith.mulf %235, %234 : vector<8x128xf32>
    %237 = math.tanh %236 : vector<8x128xf32>
    %cst_102 = arith.constant 5.000000e-01 : f32
    %238 = vector.broadcast %cst_102 : f32 to vector<8x128xf32>
    %239 = arith.mulf %238, %237 : vector<8x128xf32>
    %cst_103 = arith.constant 5.000000e-01 : f32
    %240 = vector.broadcast %cst_103 : f32 to vector<8x128xf32>
    %241 = arith.addf %239, %240 : vector<8x128xf32>
    %242 = arith.mulf %231, %205 : vector<8x128xf32>
    %243 = arith.mulf %223, %233 : vector<8x128xf32>
    %244 = arith.addf %242, %243 : vector<8x128xf32>
    %245 = math.tanh %244 : vector<8x128xf32>
    %246 = arith.mulf %241, %245 : vector<8x128xf32>
    %c5_104 = arith.constant 5 : index
    %c0_105 = arith.constant 0 : index
    %c0_106 = arith.constant 0 : index
    %247 = vector.load %arg8[%c5_104, %c0_105, %c0_106] : memref<8x8x128xf32, #tpu.memory_space<vmem>>, vector<1x8x128xf32>
    %248 = vector.shape_cast %247 : vector<1x8x128xf32> to vector<8x128xf32>
    %249 = vector.shape_cast %246 : vector<8x128xf32> to vector<1x8x128xf32>
    tpu.vector_store %arg8[%c5_104, %c0_105, %c0_106], %249 {strides = array<i32>} : memref<8x8x128xf32, #tpu.memory_space<vmem>>, vector<1x8x128xf32>,
    %250 = arith.truncf %246 : vector<8x128xf32> to vector<8x128xbf16>
    %cst_107 = arith.constant dense<0.000000e+00> : vector<8x512xf32>
    %251 = tpu.matmul %250, %13, %cst_107 {dimension_numbers = #tpu.dot_dimension_numbers<[1], [0], [0], [1], [0, 0, 1, 1], [], []>} : vector<8x128xbf16>, vector<128x512xbf16>, vector<8x512xf32> -> vector<8x512xf32>
    %c6 = arith.constant 6 : index
    %c0_108 = arith.constant 0 : index
    %c0_109 = arith.constant 0 : index
    %252 = vector.load %arg11[%c6, %c0_108, %c0_109] : memref<8x8x512xf32, #tpu.memory_space<vmem>>, vector<1x8x512xf32>
    %253 = vector.shape_cast %252 : vector<1x8x512xf32> to vector<8x512xf32>
    %254 = arith.addf %251, %253 : vector<8x512xf32>
    %255 = vector.extract_strided_slice %254 {offsets = [0, 0], sizes = [8, 128], strides = [1, 1]} : vector<8x512xf32> to vector<8x128xf32>
    %cst_110 = arith.constant 5.000000e-01 : f32
    %256 = vector.broadcast %cst_110 : f32 to vector<8x128xf32>
    %257 = arith.mulf %256, %255 : vector<8x128xf32>
    %258 = math.tanh %257 : vector<8x128xf32>
    %cst_111 = arith.constant 5.000000e-01 : f32
    %259 = vector.broadcast %cst_111 : f32 to vector<8x128xf32>
    %260 = arith.mulf %259, %258 : vector<8x128xf32>
    %cst_112 = arith.constant 5.000000e-01 : f32
    %261 = vector.broadcast %cst_112 : f32 to vector<8x128xf32>
    %262 = arith.addf %260, %261 : vector<8x128xf32>
    %263 = vector.extract_strided_slice %254 {offsets = [0, 128], sizes = [8, 128], strides = [1, 1]} : vector<8x512xf32> to vector<8x128xf32>
    %cst_113 = arith.constant 5.000000e-01 : f32
    %264 = vector.broadcast %cst_113 : f32 to vector<8x128xf32>
    %265 = arith.mulf %264, %263 : vector<8x128xf32>
    %266 = math.tanh %265 : vector<8x128xf32>
    %cst_114 = arith.constant 5.000000e-01 : f32
    %267 = vector.broadcast %cst_114 : f32 to vector<8x128xf32>
    %268 = arith.mulf %267, %266 : vector<8x128xf32>
    %cst_115 = arith.constant 5.000000e-01 : f32
    %269 = vector.broadcast %cst_115 : f32 to vector<8x128xf32>
    %270 = arith.addf %268, %269 : vector<8x128xf32>
    %271 = vector.extract_strided_slice %254 {offsets = [0, 256], sizes = [8, 128], strides = [1, 1]} : vector<8x512xf32> to vector<8x128xf32>
    %272 = math.tanh %271 : vector<8x128xf32>
    %273 = vector.extract_strided_slice %254 {offsets = [0, 384], sizes = [8, 128], strides = [1, 1]} : vector<8x512xf32> to vector<8x128xf32>
    %cst_116 = arith.constant 5.000000e-01 : f32
    %274 = vector.broadcast %cst_116 : f32 to vector<8x128xf32>
    %275 = arith.mulf %274, %273 : vector<8x128xf32>
    %276 = math.tanh %275 : vector<8x128xf32>
    %cst_117 = arith.constant 5.000000e-01 : f32
    %277 = vector.broadcast %cst_117 : f32 to vector<8x128xf32>
    %278 = arith.mulf %277, %276 : vector<8x128xf32>
    %cst_118 = arith.constant 5.000000e-01 : f32
    %279 = vector.broadcast %cst_118 : f32 to vector<8x128xf32>
    %280 = arith.addf %278, %279 : vector<8x128xf32>
    %281 = arith.mulf %270, %244 : vector<8x128xf32>
    %282 = arith.mulf %262, %272 : vector<8x128xf32>
    %283 = arith.addf %281, %282 : vector<8x128xf32>
    %284 = math.tanh %283 : vector<8x128xf32>
    %285 = arith.mulf %280, %284 : vector<8x128xf32>
    %c6_119 = arith.constant 6 : index
    %c0_120 = arith.constant 0 : index
    %c0_121 = arith.constant 0 : index
    %286 = vector.load %arg8[%c6_119, %c0_120, %c0_121] : memref<8x8x128xf32, #tpu.memory_space<vmem>>, vector<1x8x128xf32>
    %287 = vector.shape_cast %286 : vector<1x8x128xf32> to vector<8x128xf32>
    %288 = vector.shape_cast %285 : vector<8x128xf32> to vector<1x8x128xf32>
    tpu.vector_store %arg8[%c6_119, %c0_120, %c0_121], %288 {strides = array<i32>} : memref<8x8x128xf32, #tpu.memory_space<vmem>>, vector<1x8x128xf32>,
    %289 = arith.truncf %285 : vector<8x128xf32> to vector<8x128xbf16>
    %cst_122 = arith.constant dense<0.000000e+00> : vector<8x512xf32>
    %290 = tpu.matmul %289, %13, %cst_122 {dimension_numbers = #tpu.dot_dimension_numbers<[1], [0], [0], [1], [0, 0, 1, 1], [], []>} : vector<8x128xbf16>, vector<128x512xbf16>, vector<8x512xf32> -> vector<8x512xf32>
    %c7 = arith.constant 7 : index
    %c0_123 = arith.constant 0 : index
    %c0_124 = arith.constant 0 : index
    %291 = vector.load %arg11[%c7, %c0_123, %c0_124] : memref<8x8x512xf32, #tpu.memory_space<vmem>>, vector<1x8x512xf32>
    %292 = vector.shape_cast %291 : vector<1x8x512xf32> to vector<8x512xf32>
    %293 = arith.addf %290, %292 : vector<8x512xf32>
    %294 = vector.extract_strided_slice %293 {offsets = [0, 0], sizes = [8, 128], strides = [1, 1]} : vector<8x512xf32> to vector<8x128xf32>
    %cst_125 = arith.constant 5.000000e-01 : f32
    %295 = vector.broadcast %cst_125 : f32 to vector<8x128xf32>
    %296 = arith.mulf %295, %294 : vector<8x128xf32>
    %297 = math.tanh %296 : vector<8x128xf32>
    %cst_126 = arith.constant 5.000000e-01 : f32
    %298 = vector.broadcast %cst_126 : f32 to vector<8x128xf32>
    %299 = arith.mulf %298, %297 : vector<8x128xf32>
    %cst_127 = arith.constant 5.000000e-01 : f32
    %300 = vector.broadcast %cst_127 : f32 to vector<8x128xf32>
    %301 = arith.addf %299, %300 : vector<8x128xf32>
    %302 = vector.extract_strided_slice %293 {offsets = [0, 128], sizes = [8, 128], strides = [1, 1]} : vector<8x512xf32> to vector<8x128xf32>
    %cst_128 = arith.constant 5.000000e-01 : f32
    %303 = vector.broadcast %cst_128 : f32 to vector<8x128xf32>
    %304 = arith.mulf %303, %302 : vector<8x128xf32>
    %305 = math.tanh %304 : vector<8x128xf32>
    %cst_129 = arith.constant 5.000000e-01 : f32
    %306 = vector.broadcast %cst_129 : f32 to vector<8x128xf32>
    %307 = arith.mulf %306, %305 : vector<8x128xf32>
    %cst_130 = arith.constant 5.000000e-01 : f32
    %308 = vector.broadcast %cst_130 : f32 to vector<8x128xf32>
    %309 = arith.addf %307, %308 : vector<8x128xf32>
    %310 = vector.extract_strided_slice %293 {offsets = [0, 256], sizes = [8, 128], strides = [1, 1]} : vector<8x512xf32> to vector<8x128xf32>
    %311 = math.tanh %310 : vector<8x128xf32>
    %312 = vector.extract_strided_slice %293 {offsets = [0, 384], sizes = [8, 128], strides = [1, 1]} : vector<8x512xf32> to vector<8x128xf32>
    %cst_131 = arith.constant 5.000000e-01 : f32
    %313 = vector.broadcast %cst_131 : f32 to vector<8x128xf32>
    %314 = arith.mulf %313, %312 : vector<8x128xf32>
    %315 = math.tanh %314 : vector<8x128xf32>
    %cst_132 = arith.constant 5.000000e-01 : f32
    %316 = vector.broadcast %cst_132 : f32 to vector<8x128xf32>
    %317 = arith.mulf %316, %315 : vector<8x128xf32>
    %cst_133 = arith.constant 5.000000e-01 : f32
    %318 = vector.broadcast %cst_133 : f32 to vector<8x128xf32>
    %319 = arith.addf %317, %318 : vector<8x128xf32>
    %320 = arith.mulf %309, %283 : vector<8x128xf32>
    %321 = arith.mulf %301, %311 : vector<8x128xf32>
    %322 = arith.addf %320, %321 : vector<8x128xf32>
    %323 = math.tanh %322 : vector<8x128xf32>
    %324 = arith.mulf %319, %323 : vector<8x128xf32>
    %c7_134 = arith.constant 7 : index
    %c0_135 = arith.constant 0 : index
    %c0_136 = arith.constant 0 : index
    %325 = vector.load %arg8[%c7_134, %c0_135, %c0_136] : memref<8x8x128xf32, #tpu.memory_space<vmem>>, vector<1x8x128xf32>
    %326 = vector.shape_cast %325 : vector<1x8x128xf32> to vector<8x128xf32>
    %327 = vector.shape_cast %324 : vector<8x128xf32> to vector<1x8x128xf32>
    tpu.vector_store %arg8[%c7_134, %c0_135, %c0_136], %327 {strides = array<i32>} : memref<8x8x128xf32, #tpu.memory_space<vmem>>, vector<1x8x128xf32>,
    %c0_137 = arith.constant 0 : index
    %c0_138 = arith.constant 0 : index
    %328 = vector.load %arg12[%c0_137, %c0_138] : memref<8x128xf32, #tpu.memory_space<vmem>>, vector<8x128xf32>
    tpu.vector_store %arg12[%c0_137, %c0_138], %324 {strides = array<i32>} : memref<8x128xf32, #tpu.memory_space<vmem>>, vector<8x128xf32>,
    %c0_139 = arith.constant 0 : index
    %c0_140 = arith.constant 0 : index
    %329 = vector.load %arg13[%c0_139, %c0_140] : memref<8x128xf32, #tpu.memory_space<vmem>>, vector<8x128xf32>
    tpu.vector_store %arg13[%c0_139, %c0_140], %322 {strides = array<i32>} : memref<8x128xf32, #tpu.memory_space<vmem>>, vector<8x128xf32>,
    %c1_i32 = arith.constant 1 : i32
    %330 = arith.cmpi eq, %arg1, %c1_i32 : i32
    %331 = arith.extui %330 : i1 to i32
    %c0_i32_141 = arith.constant 0 : i32
    %332 = arith.cmpi ne, %331, %c0_i32_141 : i32
    scf.if %332 {
      %c0_142 = arith.constant 0 : index
      %c0_143 = arith.constant 0 : index
      %333 = vector.load %arg9[%c0_142, %c0_143] : memref<8x128xf32, #tpu.memory_space<vmem>>, vector<8x128xf32>
      tpu.vector_store %arg9[%c0_142, %c0_143], %324 {strides = array<i32>} : memref<8x128xf32, #tpu.memory_space<vmem>>, vector<8x128xf32>,
      %c0_144 = arith.constant 0 : index
      %c0_145 = arith.constant 0 : index
      %334 = vector.load %arg10[%c0_144, %c0_145] : memref<8x128xf32, #tpu.memory_space<vmem>>, vector<8x128xf32>
      tpu.vector_store %arg10[%c0_144, %c0_145], %322 {strides = array<i32>} : memref<8x128xf32, #tpu.memory_space<vmem>>, vector<8x128xf32>,
    } else {
    }
    return
  }
  func.func @transform_0(%arg0: i32, %arg1: i32) -> (i32, i32, i32) {
    %c0_i32 = arith.constant 0 : i32
    %c0_i32_0 = arith.constant 0 : i32
    return %arg1, %arg0, %c0_i32 : i32, i32, i32
  }
  func.func @transform_1(%arg0: i32, %arg1: i32) -> (i32, i32) {
    %c0_i32 = arith.constant 0 : i32
    %c0_i32_0 = arith.constant 0 : i32
    %c0_i32_1 = arith.constant 0 : i32
    return %c0_i32, %c0_i32_0 : i32, i32
  }
  func.func @transform_2(%arg0: i32, %arg1: i32) -> (i32, i32) {
    %c0_i32 = arith.constant 0 : i32
    %c0_i32_0 = arith.constant 0 : i32
    %c0_i32_1 = arith.constant 0 : i32
    return %c0_i32, %c0_i32_0 : i32, i32
  }
  func.func @transform_3(%arg0: i32, %arg1: i32) -> (i32, i32) {
    %c0_i32 = arith.constant 0 : i32
    %c0_i32_0 = arith.constant 0 : i32
    %c0_i32_1 = arith.constant 0 : i32
    return %c0_i32, %c0_i32_0 : i32, i32
  }
  func.func @transform_4(%arg0: i32, %arg1: i32) -> (i32, i32) {
    %c0_i32 = arith.constant 0 : i32
    %c0_i32_0 = arith.constant 0 : i32
    return %arg0, %c0_i32 : i32, i32
  }
  func.func @transform_5(%arg0: i32, %arg1: i32) -> (i32, i32) {
    %c0_i32 = arith.constant 0 : i32
    %c0_i32_0 = arith.constant 0 : i32
    return %arg0, %c0_i32 : i32, i32
  }
  func.func @transform_6(%arg0: i32, %arg1: i32) -> (i32, i32, i32) {
    %c0_i32 = arith.constant 0 : i32
    %c0_i32_0 = arith.constant 0 : i32
    return %arg1, %arg0, %c0_i32 : i32, i32, i32
  }
  func.func @transform_7(%arg0: i32, %arg1: i32) -> (i32, i32) {
    %c0_i32 = arith.constant 0 : i32
    %c0_i32_0 = arith.constant 0 : i32
    return %arg0, %c0_i32 : i32, i32
  }
  func.func @transform_8(%arg0: i32, %arg1: i32) -> (i32, i32) {
    %c0_i32 = arith.constant 0 : i32
    %c0_i32_0 = arith.constant 0 : i32
    return %arg0, %c0_i32 : i32, i32
  }
}

</mosaic_0001>

<bundles_post_ra>
// kernel: _lstm_seq_call.1
= control target key start
LH: loop header
LB: loop body
LE: loop exit
PB: predicated region body
PF: predicated region fallthrough
CT: control target
= control target key end

     0   :  { %14 = vsyncpa [#allocation6], 0  ;;  %s3320_s0 = inlined_call_operand.vmem [shape: f32[16,8,32], index: 0, kind: input, shape index: {}]   ;;  %s3321_s1 = inlined_call_operand.hbm [shape: bf16[32,512], index: 1, kind: input, shape index: {}]   ;;  %s3322_s2 = inlined_call_operand.vmem [shape: bf16[128,512], index: 2, kind: input, shape index: {}]   ;;  %s3323_s3 = inlined_call_operand.vmem [shape: f32[1,512], index: 3, kind: input, shape index: {}]   ;;  %s3324_s4 = inlined_call_operand.hbm [shape: f32[8,128], index: 4, kind: input, shape index: {}]   ;;  %s3325_s5 = inlined_call_operand.hbm [shape: f32[8,128], index: 5, kind: input, shape index: {}]   ;;  %s3326_s6 = inlined_call_operand.vmem [shape: f32[16,8,128], index: 6, kind: output, shape index: {0}]   ;;  %s3327_s7 = inlined_call_operand.hbm [shape: f32[8,128], index: 7, kind: output, shape index: {1}]   ;;  %s3328_s8 = inlined_call_operand.hbm [shape: f32[8,128], index: 8, kind: output, shape index: {2}]  }
   0x1   :  { %15 = vsyncpa [#allocation9], 0 }
   0x2   :  { %16 = vsyncpa [#allocation7], 0 }
   0x3   :  { %17 = vsyncpa [#allocation13], 0  ;;  %s2455_s27 = smov 0   ;;  %s2457_s28 = smov 0  }
   0x4   :  { %s2459_s29 = smov 0  }
   0x5 LB: > { %s2402_s30 = smov [#allocation8]   ;;  %s1914_s10 = sadd.s32 4294967295, %s2400_s29   ;;  %s2400_s29 = sphi %s2459_s29, %s23_s29   ;;  %s2396_s28 = sphi %s2457_s28, %s3376_s28   ;;  %s2392_s27 = sphi %s2455_s27, %s3375_s27  }
   0x6   : > { %s297_s9 = sshll.u32 %s2402_s30, 4  ;;  %p1916_p0 = scmp.ge.s32.totalorder %s2400_s29, 1  ;;  %s298_s9 = int_to_ptr.vmem [resolvable:$true] %s297_s9 }
   0x7   : > { %p263_p1 = scmp.lt.s32.totalorder %s2400_s29, 3  ;;  %p2475_p2 = scmp.eq.s32.totalorder %s1914_s10, 0 }
   0x8   : > { %s32_s13 = sadd.s32 1, %s2396_s28  ;;  %s2403_s16 = smov [#allocation5]  }
   0x9   : > { %p2479_p3 = pnand %p1916_p0, %p263_p1  ;;  %p2492_p6 = scmp.ge.s32.totalorder %s32_s13, 2 }
   0xa   : > { %s275_s17 = sshll.u32 %s2403_s16, 4  ;;  %s2247_s18 = scalar_lea.vmem %s298_s9, 128  ;;  %s276_s17 = int_to_ptr.vmem [resolvable:$true] %s275_s17 }
   0xb   : > { %p2012_p4 = pneg %p2479_p3  ;;  %p2248_p8 = scmp.ne.s32.totalorder %s298_s9, %s2247_s18 }
   0xc   : > { %p2255_p11 = scmp.lt.s32.totalorder %s298_s9, %s298_s9  ;;  %p2256_p12 = scmp.lt.s32.totalorder %s2247_s18, %s2247_s18 }
   0xd   : > { %p2488_p5 = pnand %p2475_p2, %p2012_p4 }
   0xe   : > { %p2257_p13 = por %p2256_p12, %p2255_p11 }
   0xf   : > { %p2238_p7 = pneg %p2488_p5 }
  0x11   : > { %p2250_p9 = pnand %p2248_p8, %p2238_p7 }
  0x13   : > { %p2251_p10 = pneg %p2250_p9 }
  0x15   : > { %p2258_p0 = pnand %p2257_p13, %p2251_p10 }
  0x17   : > { %2261 = shalt.err (!%p2258_p0)
}
  0x18   : > { %2018 = dma.hbm_to_vmem [thread:$0]  (!%p2488_p5), %s3324_s4, 128, %s298_s9, [#allocation9]  }
  0x19   : > { %s3378_s13 = smov (%p2492_p6, %s32_s13), 0  ;;  %s2273_s21 = scalar_lea.vmem %s276_s17, 1024 }
  0x1a   : > { %p2274_p1 = scmp.ne.s32.totalorder %s276_s17, %s2273_s21  ;;  %p2281_p9 = scmp.lt.s32.totalorder %s276_s17, %s276_s17 }
  0x1b   : > { %p2282_p10 = scmp.lt.s32.totalorder %s2273_s21, %s2273_s21 }
  0x1c   : > { %p2276_p4 = pnand %p2274_p1, %p2238_p7 }
  0x1d   : > { %p2283_p11 = por %p2282_p10, %p2281_p9 }
  0x1e   : > { %p2277_p8 = pneg %p2276_p4 }
  0x20   : > { %p2284_p12 = pnand %p2283_p11, %p2277_p8 }
  0x22   : > { %2287 = shalt.err (!%p2284_p12)
}
  0x23   : > { %s2404_s22 = smov 256   ;;  %s2405_s23 = smov 16  }
  0x24   : > { %2015 = dma.hbm_to_vmem [thread:$0]  (!%p2488_p5), %s3321_s1, 1024, %s276_s17, [#allocation6], %s2404_s22, %s2404_s22, %s2405_s23  }
  0x25   : > { %s2406_s26 = smov [#allocation10]  }
  0x26   : > { %s310_s30 = sshll.u32 %s2406_s26, 4  ;;  %s311_s30 = int_to_ptr.vmem [resolvable:$true] %s310_s30 }
  0x27   : > { %s2299_s9 = scalar_lea.vmem %s311_s30, 128  ;;  %p2307_p1 = scmp.lt.s32.totalorder %s311_s30, %s311_s30 }
  0x28   : > { %p2300_p6 = scmp.ne.s32.totalorder %s311_s30, %s2299_s9  ;;  %p2308_p4 = scmp.lt.s32.totalorder %s2299_s9, %s2299_s9 }
  0x2a   : > { %p2302_p13 = pnand %p2300_p6, %p2238_p7  ;;  %p2309_p8 = por %p2308_p4, %p2307_p1 }
  0x2c   : > { %p2303_p0 = pneg %p2302_p13 }
  0x2e   : > { %p2310_p9 = pnand %p2309_p8, %p2303_p0 }
  0x30   : > { %2313 = shalt.err (!%p2310_p9)
}
  0x31   : > { %2021 = dma.hbm_to_vmem [thread:$0]  (!%p2488_p5), %s3325_s5, 128, %s311_s30, [#allocation9]  }
  0x32   : > { %335 = sbr.rel (%p2479_p3) target bundleno = 2049 (0x801), region = 44 }
  0x37   : > { %2375 = dma.done.wait (%p2475_p2), [#allocation6], 1024  }
  0x38   : > { %2377 = vsyncadd (%p2475_p2), [#allocation6], 4294966272 }
  0x39   : > { %2379 = dma.done.wait (%p2475_p2), [#allocation9], 256  }
  0x3a   : > { %2381 = vsyncadd (%p2475_p2), [#allocation9], 4294967040  ;;  %s1925_s14 = sshll.u32 %s2392_s27, 3  ;;  %p1929_p3 = scmp.ne.s32.totalorder %s2392_s27, 0 }
  0x3b   : > { %p384_p7 = scmp.lt.s32.totalorder %s1925_s14, 15 }
  0x3c   : > { %405 = sbr.rel (%p1929_p3) target bundleno = 67 (0x43), region = 60 }
  0x3d   : > { %s3380_s14 = smov (!%p384_p7, %s1925_s14), 15 }
  0x3e   : > { %s1926_s17 = sshll.u32 %s3380_s14, 3 }
  0x3f   : > { %s2540_s19 = scalar_lea.vmem %s3320_s0, %s1926_s17  ;;  %s2545_s22 = scalar_lea.vmem %s3326_s6, %s1926_s17 }
  0x41   : > { %v406_v0 = vld [vmem:[#allocation8] sm:$0xff]  ;;  %v408_v1 = vld [vmem:[#allocation10] sm:$0xff] }
  0x42   : > { %407 = vst [vmem:[#allocation3] sm:$0xff] %v406_v0  ;;  %409 = vst [vmem:[#allocation4] sm:$0xff] %v408_v1 }
  0x43 PF: > { %v2064_v2 = vld [vmem:[#allocation5 + $0x24] ss:$16 sps:$4 sm:$0xff]   ;;  %v2066_v3 = vld [vmem:[#allocation5 + $0x2c] ss:$16 sps:$4 sm:$0xff]   ;;  %v3329_v4 = vmov 0   ;;  %vm492_vm0 = vcmask 261120   ;;  %v432_v57 = vlaneseq }
  0x44   : > { %537 = vmatprep.mubr.bf16.mxu0 %v3329_v4  ;;  %610 = vmatprep.mubr.bf16.mxu1 %v3329_v4  ;;  %v2068_v5 = vld [vmem:[#allocation5 + $0x20] ss:$16 sps:$4 sm:$0xff]   ;;  %v2069_v6 = vld [vmem:[#allocation5 + $0x28] ss:$16 sps:$4 sm:$0xff]   ;;  %v2070_v7 = vld [vmem:[#allocation5 + $0x4] ss:$16 sps:$4 sm:$0xff]  }
  0x45   : > { %517 = vmatprep.subr.bf16.mxu0 %v2064_v2  ;;  %590 = vmatprep.subr.bf16.mxu1 %v2066_v3  ;;  %v2072_v8 = vld [vmem:[#allocation5 + $0xc] ss:$16 sps:$4 sm:$0xff]   ;;  %v2074_v9 = vld [vmem:[#allocation5] ss:$16 sps:$4 sm:$0xff]   ;;  %v2075_v10 = vld [vmem:[#allocation5 + $0x8] ss:$16 sps:$4 sm:$0xff]  }
  0x46   : > { %518 = vmatpush1.bf16.msra.mxu0 %v2068_v5  ;;  %591 = vmatpush1.bf16.msra.mxu1 %v2069_v6  ;;  %v410_v11 = vld [vmem:[%s2540_s19] sm:$0xff]  ;;  %v411_v12 = vld [vmem:[%s2540_s19 + $0x8] sm:$0xff]  ;;  %v412_v22 = vld [vmem:[%s2540_s19 + $0x10] sm:$0xff]  ;;  %v433_v58 = vshrl.u32 %v432_v57, 7  ;;  %p1985_p2 = scmp.ne.s32.totalorder %s2392_s27, 1 }
  0x47   : > { %519 = vmatprep.subr.bf16.mxu0 %v2070_v7  ;;  %592 = vmatprep.subr.bf16.mxu1 %v2072_v8  ;;  %v2555_v13 = vld [vmem:[%s3322_s2 + $0xe4] ss:$16 sps:$4 sm:$0xff]   ;;  %v418_v14 = vpack.c.bf16 %v411_v12, %v410_v11  ;;  %v2560_v15 = vld [vmem:[%s3322_s2 + $0xec] ss:$16 sps:$4 sm:$0xff]   ;;  %v2565_v16 = vld [vmem:[%s3322_s2 + $0xe0] ss:$16 sps:$4 sm:$0xff]  }
  0x48   : > { %v2570_v17 = vld [vmem:[%s3322_s2 + $0xe8] ss:$16 sps:$4 sm:$0xff]   ;;  %v2577_v18 = vld [vmem:[%s3322_s2 + $0xc4] ss:$16 sps:$4 sm:$0xff]   ;;  %v2582_v19 = vld [vmem:[%s3322_s2 + $0xcc] ss:$16 sps:$4 sm:$0xff]  }
  0x49   : > { %v2587_v20 = vld [vmem:[%s3322_s2 + $0xc0] ss:$16 sps:$4 sm:$0xff]   ;;  %v2594_v21 = vld [vmem:[%s3322_s2 + $0xc8] ss:$16 sps:$4 sm:$0xff]   ;;  %v2603_v24 = vld [vmem:[%s3322_s2 + $0xa4] ss:$16 sps:$4 sm:$0xff]  }
  0x4a   : > { %520 = vmatpush1.bf16.msra.mxu0 %v2074_v9  ;;  %593 = vmatpush1.bf16.msra.mxu1 %v2075_v10  ;;  %v413_v23 = vld [vmem:[%s2540_s19 + $0x18] sm:$0xff]  ;;  %v2619_v27 = vld [vmem:[%s3322_s2 + $0xa0] ss:$16 sps:$4 sm:$0xff]   ;;  %v2631_v29 = vld [vmem:[%s3322_s2 + $0x84] ss:$16 sps:$4 sm:$0xff]   ;;  %v442_v59 = vsub.s32 2, %v433_v58 }
  0x4b   : > { %882 = vmatprep.subr.bf16.mxu0 %v2555_v13  ;;  %923 = vmatprep.subr.bf16.mxu1 %v2560_v15  ;;  %v2610_v25 = vld [vmem:[%s3322_s2 + $0xac] ss:$16 sps:$4 sm:$0xff]   ;;  %v419_v26 = vpack.c.bf16 %v413_v23, %v412_v22  ;;  %v2624_v28 = vld [vmem:[%s3322_s2 + $0xa8] ss:$16 sps:$4 sm:$0xff]   ;;  %v2641_v31 = vld [vmem:[%s3322_s2 + $0x80] ss:$16 sps:$4 sm:$0xff]  }
  0x4c   : > { %v2636_v30 = vld [vmem:[%s3322_s2 + $0x8c] ss:$16 sps:$4 sm:$0xff]   ;;  %v2646_v32 = vld [vmem:[%s3322_s2 + $0x88] ss:$16 sps:$4 sm:$0xff]   ;;  %v414_v33 = vld [vmem:[%s2540_s19 + $0x20] sm:$0xff]  ;;  %v434_v60 = vsub.s32 0, %v433_v58 }
  0x4d   : > { %1938 = vmatmul.mubr.msk.bf16.vlgmr.msra.gmra.mxu0 %vm492_vm0, %v418_v14  ;;  %1942 = vmatmul.mubr.msk.bf16.vlgmr.msra.gmra.mxu1 %vm492_vm0, %v418_v14  ;;  %v415_v34 = vld [vmem:[%s2540_s19 + $0x28] sm:$0xff]  ;;  %v2657_v35 = vld [vmem:[%s3322_s2 + $0x64] ss:$16 sps:$4 sm:$0xff]   ;;  %v2671_v38 = vld [vmem:[%s3322_s2 + $0x60] ss:$16 sps:$4 sm:$0xff]   ;;  %v446_v61 = vsub.s32 3, %v433_v58 }
  0x4e   : > { %883 = vmatpush1.bf16.msra.mxu0 %v2565_v16  ;;  %924 = vmatpush1.bf16.msra.mxu1 %v2570_v17  ;;  %v2664_v36 = vld [vmem:[%s3322_s2 + $0x6c] ss:$16 sps:$4 sm:$0xff]   ;;  %v420_v37 = vpack.c.bf16 %v415_v34, %v414_v33  ;;  %v2676_v39 = vld [vmem:[%s3322_s2 + $0x68] ss:$16 sps:$4 sm:$0xff]   ;;  %v2683_v40 = vld [vmem:[%s3322_s2 + $0x44] ss:$16 sps:$4 sm:$0xff]  }
  0x4f   : > { %884 = vmatprep.subr.bf16.mxu0 %v2577_v18  ;;  %925 = vmatprep.subr.bf16.mxu1 %v2582_v19  ;;  %v2690_v41 = vld [vmem:[%s3322_s2 + $0x4c] ss:$16 sps:$4 sm:$0xff]   ;;  %v2695_v42 = vld [vmem:[%s3322_s2 + $0x40] ss:$16 sps:$4 sm:$0xff]   ;;  %v2702_v43 = vld [vmem:[%s3322_s2 + $0x48] ss:$16 sps:$4 sm:$0xff]  }
  0x50   : > { %547 = vmatprep.mubr.bf16.mxu0 %v3329_v4  ;;  %620 = vmatprep.mubr.bf16.mxu1 %v3329_v4  ;;  %v416_v44 = vld [vmem:[%s2540_s19 + $0x30] sm:$0xff]  ;;  %v417_v45 = vld [vmem:[%s2540_s19 + $0x38] sm:$0xff]  ;;  %v715_v55 = vld [vmem:[#allocation3] sm:$0xff]  ;;  %v438_v2 = vsub.s32 1, %v433_v58 }
  0x51   : > { %v2713_v46 = vld [vmem:[%s3322_s2 + $0x24] ss:$16 sps:$4 sm:$0xff]   ;;  %v2718_v47 = vld [vmem:[%s3322_s2 + $0x2c] ss:$16 sps:$4 sm:$0xff]   ;;  %v421_v48 = vpack.c.bf16 %v417_v45, %v416_v44  ;;  %v2727_v49 = vld [vmem:[%s3322_s2 + $0x20] ss:$16 sps:$4 sm:$0xff]   ;;  %v717_v56 = vpack.c.bf16 %v715_v55, %v715_v55 }
  0x52   : > { %885 = vmatpush1.bf16.msra.mxu0 %v2587_v20  ;;  %926 = vmatpush1.bf16.msra.mxu1 %v2594_v21  ;;  %v2732_v50 = vld [vmem:[%s3322_s2 + $0x28] ss:$16 sps:$4 sm:$0xff]   ;;  %v2739_v51 = vld [vmem:[%s3322_s2 + $0x4] ss:$16 sps:$4 sm:$0xff]   ;;  %v2744_v52 = vld [vmem:[%s3322_s2 + $0xc] ss:$16 sps:$4 sm:$0xff]  }
  0x53   : > { %886 = vmatprep.subr.bf16.mxu0 %v2603_v24  ;;  %927 = vmatprep.subr.bf16.mxu1 %v2610_v25  ;;  %v2753_v53 = vld [vmem:[%s3322_s2] ss:$16 sps:$4 sm:$0xff]   ;;  %v2758_v54 = vld [vmem:[%s3322_s2 + $0x8] ss:$16 sps:$4 sm:$0xff]  }
  0x54   : > { %v430_v62 = vld [vmem:[%s3323_s3] sm:$0xf] }
  0x55   : > { %1939 = vmatmul.mubr.msk.bf16.gmra.mxu0 %vm492_vm0, %v419_v26  ;;  %1943 = vmatmul.mubr.msk.bf16.gmra.mxu1 %vm492_vm0, %v419_v26  ;;  %v2809_v1 = vrot.slane %v430_v62, %v442_v59  ;;  %v435_v6 = vrot.slane %v430_v62, %v434_v60  ;;  %v2815_v7 = vrot.slane %v430_v62, %v446_v61 }
  0x56   : > { %887 = vmatpush1.bf16.msra.mxu0 %v2619_v27  ;;  %928 = vmatpush1.bf16.msra.mxu1 %v2624_v28  ;;  %v439_v10 = vrot.slane %v430_v62, %v438_v2 }
  0x57   : > { %888 = vmatprep.subr.bf16.mxu0 %v2631_v29  ;;  %929 = vmatprep.subr.bf16.mxu1 %v2636_v30 }
  0x58   : > { %557 = vmatprep.mubr.bf16.mxu0 %v3329_v4  ;;  %630 = vmatprep.mubr.bf16.mxu1 %v3329_v4 }
  0x5a   : > { %889 = vmatpush1.bf16.msra.mxu0 %v2641_v31  ;;  %930 = vmatpush1.bf16.msra.mxu1 %v2646_v32 }
  0x5b   : > { %890 = vmatprep.subr.bf16.mxu0 %v2657_v35  ;;  %931 = vmatprep.subr.bf16.mxu1 %v2664_v36 }
  0x5d   : > { %1940 = vmatmul.mubr.msk.bf16.gmra.mxu0 %vm492_vm0, %v420_v37  ;;  %1944 = vmatmul.mubr.msk.bf16.gmra.mxu1 %vm492_vm0, %v420_v37 }
  0x5e   : > { %891 = vmatpush1.bf16.msra.mxu0 %v2671_v38  ;;  %932 = vmatpush1.bf16.msra.mxu1 %v2676_v39 }
  0x5f   : > { %892 = vmatprep.subr.bf16.mxu0 %v2683_v40  ;;  %933 = vmatprep.subr.bf16.mxu1 %v2690_v41 }
  0x60   : > { %567 = vmatprep.mubr.bf16.mxu0 %v3329_v4  ;;  %640 = vmatprep.mubr.bf16.mxu1 %v3329_v4 }
  0x62   : > { %893 = vmatpush1.bf16.msra.mxu0 %v2695_v42  ;;  %934 = vmatpush1.bf16.msra.mxu1 %v2702_v43 }
  0x63   : > { %894 = vmatprep.subr.bf16.mxu0 %v2713_v46  ;;  %935 = vmatprep.subr.bf16.mxu1 %v2718_v47 }
  0x65   : > { %1941 = vmatmul.mubr.msk.bf16.gmra.mxu0 %vm492_vm0, %v421_v48  ;;  %1945 = vmatmul.mubr.msk.bf16.gmra.mxu1 %vm492_vm0, %v421_v48 }
  0x66   : > { %895 = vmatpush1.bf16.msra.mxu0 %v2727_v49  ;;  %936 = vmatpush1.bf16.msra.mxu1 %v2732_v50 }
  0x67   : > { %896 = vmatprep.subr.bf16.mxu0 %v2739_v51  ;;  %937 = vmatprep.subr.bf16.mxu1 %v2744_v52 }
  0x68   : > { %914 = vmatprep.mubr.bf16.mxu0 %v3329_v4  ;;  %955 = vmatprep.mubr.bf16.mxu1 %v3329_v4 }
  0x6a   : > { %897 = vmatpush1.bf16.msra.mxu0 %v2753_v53  ;;  %938 = vmatpush1.bf16.msra.mxu1 %v2758_v54 }
  0x6b   : > { %989 = vmatprep.subr.bf16.mxu0 %v2555_v13  ;;  %1030 = vmatprep.subr.bf16.mxu1 %v2560_v15 }
  0x6d   : > { %915 = vmatmul.mubr.bf16.vlgmr.msra.gmra.mxu0 %v717_v56  ;;  %956 = vmatmul.mubr.bf16.vlgmr.msra.gmra.mxu1 %v717_v56 }
  0x6e   : > { %990 = vmatpush1.bf16.msra.mxu0 %v2565_v16  ;;  %1031 = vmatpush1.bf16.msra.mxu1 %v2570_v17 }
  0x6f   : > { %991 = vmatprep.subr.bf16.mxu0 %v2577_v18  ;;  %1032 = vmatprep.subr.bf16.mxu1 %v2582_v19 }
  0x70   : > { %1021 = vmatprep.mubr.bf16.mxu0 %v3329_v4  ;;  %1062 = vmatprep.mubr.bf16.mxu1 %v3329_v4 }
  0x72   : > { %992 = vmatpush1.bf16.msra.mxu0 %v2587_v20  ;;  %1033 = vmatpush1.bf16.msra.mxu1 %v2594_v21 }
  0x73   : > { %993 = vmatprep.subr.bf16.mxu0 %v2603_v24  ;;  %1034 = vmatprep.subr.bf16.mxu1 %v2610_v25 }
  0x76   : > { %994 = vmatpush1.bf16.msra.mxu0 %v2619_v27  ;;  %1035 = vmatpush1.bf16.msra.mxu1 %v2624_v28 }
  0x77   : > { %995 = vmatprep.subr.bf16.mxu0 %v2631_v29  ;;  %1036 = vmatprep.subr.bf16.mxu1 %v2636_v30 }
  0x7a   : > { %996 = vmatpush1.bf16.msra.mxu0 %v2641_v31  ;;  %1037 = vmatpush1.bf16.msra.mxu1 %v2646_v32 }
  0x7b   : > { %997 = vmatprep.subr.bf16.mxu0 %v2657_v35  ;;  %1038 = vmatprep.subr.bf16.mxu1 %v2664_v36 }
  0x7e   : > { %998 = vmatpush1.bf16.msra.mxu0 %v2671_v38  ;;  %1039 = vmatpush1.bf16.msra.mxu1 %v2676_v39 }
  0x7f   : > { %999 = vmatprep.subr.bf16.mxu0 %v2683_v40  ;;  %1040 = vmatprep.subr.bf16.mxu1 %v2690_v41 }
  0x82   : > { %1000 = vmatpush1.bf16.msra.mxu0 %v2695_v42  ;;  %1041 = vmatpush1.bf16.msra.mxu1 %v2702_v43 }
  0x83   : > { %1001 = vmatprep.subr.bf16.mxu0 %v2713_v46  ;;  %1042 = vmatprep.subr.bf16.mxu1 %v2718_v47 }
  0x86   : > { %1002 = vmatpush1.bf16.msra.mxu0 %v2727_v49  ;;  %1043 = vmatpush1.bf16.msra.mxu1 %v2732_v50 }
  0x87   : > { %1003 = vmatprep.subr.bf16.mxu0 %v2739_v51  ;;  %1044 = vmatprep.subr.bf16.mxu1 %v2744_v52 }
  0x8a   : > { %1004 = vmatpush1.bf16.msra.mxu0 %v2753_v53  ;;  %1045 = vmatpush1.bf16.msra.mxu1 %v2758_v54 }
  0x8b   : > { %1097 = vmatprep.subr.bf16.mxu0 %v2555_v13  ;;  %1138 = vmatprep.subr.bf16.mxu1 %v2560_v15 }
 0x10d   : > { %v2805_v63 = vpop.f32.mrf.mxu0  ;;  %v2807_v0 = vpop.f32.mrf.mxu1 }
 0x10f   : > { %v2811_v3 = vpop.f32.mrf.mxu0  ;;  %v2813_v5 = vpop.f32.mrf.mxu1 }
 0x111   : > { %v543_v8 = vpop.f32.mrf.mxu0  ;;  %v616_v9 = vpop.f32.mrf.mxu1 }
 0x112   : > { %v2817_v11 = vadd.f32 %v543_v8, %v435_v6  ;;  %v2820_v12 = vadd.f32 %v616_v9, %v2809_v1 }
 0x113   : > { %v545_v14 = vpop.f32.mrf.mxu0  ;;  %v618_v22 = vpop.f32.mrf.mxu1 }
 0x114   : > { %v2822_v23 = vadd.f32 %v545_v14, %v439_v10  ;;  %v2825_v26 = vadd.f32 %v618_v22, %v2815_v7 }
 0x115   : > { %v549_v33 = vpop.f32.mrf.mxu0  ;;  %v622_v34 = vpop.f32.mrf.mxu1 }
 0x116   : > { %v2827_v37 = vadd.f32 %v549_v33, %v435_v6  ;;  %v2830_v44 = vadd.f32 %v622_v34, %v2809_v1 }
 0x117   : > { %v551_v45 = vpop.f32.mrf.mxu0  ;;  %v624_v48 = vpop.f32.mrf.mxu1 }
 0x118   : > { %v2832_v55 = vadd.f32 %v551_v45, %v439_v10  ;;  %v2835_v56 = vadd.f32 %v624_v48, %v2815_v7 }
 0x119   : > { %v553_v57 = vpop.f32.mrf.mxu0  ;;  %v626_v58 = vpop.f32.mrf.mxu1 }
 0x11a   : > { %v2837_v59 = vadd.f32 %v553_v57, %v435_v6  ;;  %v2840_v60 = vadd.f32 %v626_v58, %v2809_v1 }
 0x11b   : > { %v555_v61 = vpop.f32.mrf.mxu0  ;;  %v628_v62 = vpop.f32.mrf.mxu1 }
 0x11c   : > { %3335 = vst [vmem:[#allocation18_spill] sm:$0xff] %v2837_v59  ;;  %3336 = vst [vmem:[#allocation19_spill] sm:$0xff] %v2840_v60  ;;  %v2842_v2 = vadd.f32 %v555_v61, %v439_v10  ;;  %v2845_v8 = vadd.f32 %v628_v62, %v2815_v7  ;;  %v613_v59 = vadd.f32 %v2807_v0, %v2809_v1  ;;  %v716_v0 = vld [vmem:[#allocation4] sm:$0xff] }
 0x11d   : > { %v559_v9 = vpop.f32.mrf.mxu0  ;;  %v632_v14 = vpop.f32.mrf.mxu1 }
 0x11e   : > { %3337 = vst [vmem:[#allocation20_spill] sm:$0xff] %v2842_v2  ;;  %3338 = vst [vmem:[#allocation21_spill] sm:$0xff] %v2845_v8  ;;  %v2847_v22 = vadd.f32 %v559_v9, %v435_v6  ;;  %v2850_v33 = vadd.f32 %v632_v14, %v2809_v1 }
 0x11f   : > { %v561_v34 = vpop.f32.mrf.mxu0  ;;  %v634_v45 = vpop.f32.mrf.mxu1 }
 0x120   : > { %3339 = vst [vmem:[#allocation22_spill] sm:$0xff] %v2847_v22  ;;  %3340 = vst [vmem:[#allocation23_spill] sm:$0xff] %v2850_v33  ;;  %v2852_v48 = vadd.f32 %v561_v34, %v439_v10  ;;  %v2855_v57 = vadd.f32 %v634_v45, %v2815_v7 }
 0x121   : > { %v563_v58 = vpop.f32.mrf.mxu0  ;;  %v636_v61 = vpop.f32.mrf.mxu1 }
 0x122   : > { %3341 = vst [vmem:[#allocation24_spill] sm:$0xff] %v2852_v48  ;;  %3342 = vst [vmem:[#allocation25_spill] sm:$0xff] %v2855_v57  ;;  %v2857_v4 = vadd.f32 %v563_v58, %v435_v6  ;;  %v2860_v62 = vadd.f32 %v636_v61, %v2809_v1 }
 0x123   : > { %v565_v8 = vpop.f32.mrf.mxu0  ;;  %v638_v9 = vpop.f32.mrf.mxu1 }
 0x124   : > { %3343 = vst [vmem:[#allocation26_spill] sm:$0xff] %v2857_v4  ;;  %3344 = vst [vmem:[#allocation27_spill] sm:$0xff] %v2860_v62  ;;  %v2862_v22 = vadd.f32 %v565_v8, %v439_v10  ;;  %v2865_v14 = vadd.f32 %v638_v9, %v2815_v7 }
 0x125   : > { %v569_v33 = vpop.f32.mrf.mxu0  ;;  %v642_v34 = vpop.f32.mrf.mxu1 }
 0x126   : > { %3345 = vst [vmem:[#allocation28_spill] sm:$0xff] %v2862_v22  ;;  %3346 = vst [vmem:[#allocation29_spill] sm:$0xff] %v2865_v14  ;;  %v2867_v48 = vadd.f32 %v569_v33, %v435_v6  ;;  %v2870_v45 = vadd.f32 %v642_v34, %v2809_v1 }
 0x127   : > { %v571_v57 = vpop.f32.mrf.mxu0  ;;  %v644_v58 = vpop.f32.mrf.mxu1 }
 0x128   : > { %3347 = vst [vmem:[#allocation30_spill] sm:$0xff] %v2867_v48  ;;  %3348 = vst [vmem:[#allocation31_spill] sm:$0xff] %v2870_v45  ;;  %v2872_v4 = vadd.f32 %v571_v57, %v439_v10  ;;  %v2875_v61 = vadd.f32 %v644_v58, %v2815_v7  ;;  %v540_v48 = vadd.f32 %v2805_v63, %v435_v6 }
 0x129   : > { %v573_v62 = vpop.f32.mrf.mxu0  ;;  %v646_v8 = vpop.f32.mrf.mxu1  ;;  %v542_v58 = vadd.f32 %v2811_v3, %v439_v10 }
 0x12a   : > { %3349 = vst [vmem:[#allocation32_spill] sm:$0xff] %v2872_v4  ;;  %3350 = vst [vmem:[#allocation33_spill] sm:$0xff] %v2875_v61  ;;  %v2877_v22 = vadd.f32 %v573_v62, %v435_v6  ;;  %v2880_v9 = vadd.f32 %v646_v8, %v2809_v1 }
 0x12b   : > { %v575_v14 = vpop.f32.mrf.mxu0  ;;  %v648_v33 = vpop.f32.mrf.mxu1 }
 0x12c   : > { %3351 = vst [vmem:[#allocation34_spill] sm:$0xff] %v2877_v22  ;;  %3352 = vst [vmem:[#allocation35_spill] sm:$0xff] %v2880_v9  ;;  %v2883_v34 = vadd.f32 %v575_v14, %v439_v10  ;;  %v2886_v45 = vadd.f32 %v648_v33, %v2815_v7 }
 0x12d   : > { %v916_v57 = vpop.f32.mrf.mxu0  ;;  %v957_v4 = vpop.f32.mrf.mxu1 }
 0x12e   : > { %3353 = vst [vmem:[#allocation36_spill] sm:$0xff] %v2886_v45  ;;  %v917_v61 = vadd.f32 %v916_v57, %v540_v48  ;;  %v958_v33 = vadd.f32 %v957_v4, %v613_v59  ;;  %v615_v45 = vadd.f32 %v2813_v5, %v2815_v7 }
 0x12f   : > { %v918_v60 = vpop.f32.mrf.mxu0  ;;  %v959_v62 = vpop.f32.mrf.mxu1 }
 0x130   : > { %v964_v22 = vmul.f32 0.5, %v917_v61  ;;  %v919_v2 = vadd.f32 %v918_v60, %v542_v58  ;;  %v960_v3 = vadd.f32 %v959_v62, %v615_v45 }
 0x131   : > { %v920_v8 = vpop.f32.mrf.mxu0  ;;  %v961_v9 = vpop.f32.mrf.mxu1 }
 0x132   : > { %2124 = vtanh.f32 %v964_v22  ;;  %v968_v63 = vmul.f32 0.5, %v919_v2  ;;  %v973_v10 = vmul.f32 0.5, %v960_v3 }
 0x133   : > { %v921_v6 = vpop.f32.mrf.mxu0  ;;  %v962_v14 = vpop.f32.mrf.mxu1 }
 0x134   : > { %2126 = vtanh.f32 %v968_v63  ;;  %v3354_v63 = vmov 0  }
 0x135   : > { %2128 = vtanh.f32 %v958_v33 }
 0x136   : > { %2130 = vtanh.f32 %v973_v10 }
 0x13f   : > { %v2125_v48 = vpop.eup %2124 }
 0x140   : > { %v966_v61 = vmul.f32 0.5, %v2125_v48 }
 0x141   : > { %v2127_v60 = vpop.eup %2126 }
 0x142   : > { %v967_v9 = vadd.f32 0.5, %v966_v61  ;;  %v970_v57 = vmul.f32 0.5, %v2127_v60  ;;  %v2129_v2 = vpop.eup %2128 }
 0x143   : > { %v2131_v5 = vpop.eup %2130 }
 0x144   : > { %v971_v1 = vadd.f32 0.5, %v970_v57  ;;  %v978_v58 = vmul.f32 %v2129_v2, %v967_v9  ;;  %v975_v7 = vmul.f32 0.5, %v2131_v5 }
 0x146   : > { %v977_v22 = vmul.f32 %v971_v1, %v716_v0  ;;  %v976_v59 = vadd.f32 0.5, %v975_v7 }
 0x148   : > { %v2893_v4 = vadd.f32 %v978_v58, %v977_v22 }
 0x14a   : > { %2132 = vtanh.f32 %v2893_v4 }
 0x157   : > { %v2133_v45 = vpop.eup %2132 }
 0x158   : > { %v981_v62 = vmul.f32 %v2133_v45, %v976_v59 }
 0x15a   : > { %982 = vst [vmem:[%s2545_s22] sm:$0xff] %v981_v62  ;;  %v983_v8 = vpack.c.bf16 %v981_v62, %v981_v62 }
 0x15c   : > { %1022 = vmatmul.mubr.bf16.vlgmr.msra.gmra.mxu0 %v983_v8  ;;  %1063 = vmatmul.mubr.bf16.vlgmr.msra.gmra.mxu1 %v983_v8 }
 0x15d   : > { %1098 = vmatpush1.bf16.msra.mxu0 %v2565_v16  ;;  %1139 = vmatpush1.bf16.msra.mxu1 %v2570_v17 }
 0x15e   : > { %1099 = vmatprep.subr.bf16.mxu0 %v2577_v18  ;;  %1140 = vmatprep.subr.bf16.mxu1 %v2582_v19 }
 0x15f   : > { %1129 = vmatprep.mubr.bf16.mxu0 %v3354_v63  ;;  %1170 = vmatprep.mubr.bf16.mxu1 %v3354_v63 }
 0x161   : > { %1100 = vmatpush1.bf16.msra.mxu0 %v2587_v20  ;;  %1141 = vmatpush1.bf16.msra.mxu1 %v2594_v21 }
 0x162   : > { %1101 = vmatprep.subr.bf16.mxu0 %v2603_v24  ;;  %1142 = vmatprep.subr.bf16.mxu1 %v2610_v25 }
 0x165   : > { %1102 = vmatpush1.bf16.msra.mxu0 %v2619_v27  ;;  %1143 = vmatpush1.bf16.msra.mxu1 %v2624_v28 }
 0x166   : > { %1103 = vmatprep.subr.bf16.mxu0 %v2631_v29  ;;  %1144 = vmatprep.subr.bf16.mxu1 %v2636_v30 }
 0x169   : > { %1104 = vmatpush1.bf16.msra.mxu0 %v2641_v31  ;;  %1145 = vmatpush1.bf16.msra.mxu1 %v2646_v32 }
 0x16a   : > { %1105 = vmatprep.subr.bf16.mxu0 %v2657_v35  ;;  %1146 = vmatprep.subr.bf16.mxu1 %v2664_v36 }
 0x16d   : > { %1106 = vmatpush1.bf16.msra.mxu0 %v2671_v38  ;;  %1147 = vmatpush1.bf16.msra.mxu1 %v2676_v39 }
 0x16e   : > { %1107 = vmatprep.subr.bf16.mxu0 %v2683_v40  ;;  %1148 = vmatprep.subr.bf16.mxu1 %v2690_v41 }
 0x171   : > { %1108 = vmatpush1.bf16.msra.mxu0 %v2695_v42  ;;  %1149 = vmatpush1.bf16.msra.mxu1 %v2702_v43 }
 0x172   : > { %1109 = vmatprep.subr.bf16.mxu0 %v2713_v46  ;;  %1150 = vmatprep.subr.bf16.mxu1 %v2718_v47 }
 0x175   : > { %1110 = vmatpush1.bf16.msra.mxu0 %v2727_v49  ;;  %1151 = vmatpush1.bf16.msra.mxu1 %v2732_v50 }
 0x176   : > { %1111 = vmatprep.subr.bf16.mxu0 %v2739_v51  ;;  %1152 = vmatprep.subr.bf16.mxu1 %v2744_v52 }
 0x179   : > { %1112 = vmatpush1.bf16.msra.mxu0 %v2753_v53  ;;  %1153 = vmatpush1.bf16.msra.mxu1 %v2758_v54 }
 0x17a   : > { %1205 = vmatprep.subr.bf16.mxu0 %v2555_v13  ;;  %1246 = vmatprep.subr.bf16.mxu1 %v2560_v15 }
 0x21c   : > { %v1023_v6 = vpop.f32.mrf.mxu0  ;;  %v1064_v14 = vpop.f32.mrf.mxu1 }
 0x21d   : > { %v1024_v33 = vadd.f32 %v1023_v6, %v2817_v11  ;;  %v1065_v57 = vadd.f32 %v1064_v14, %v2820_v12 }
 0x21e   : > { %v1025_v3 = vpop.f32.mrf.mxu0  ;;  %v1066_v10 = vpop.f32.mrf.mxu1 }
 0x21f   : > { %v1071_v48 = vmul.f32 0.5, %v1024_v33  ;;  %v1026_v61 = vadd.f32 %v1025_v3, %v2822_v23  ;;  %v1067_v22 = vadd.f32 %v1066_v10, %v2825_v26 }
 0x220   : > { %v1027_v60 = vpop.f32.mrf.mxu0  ;;  %v1068_v9 = vpop.f32.mrf.mxu1 }
 0x221   : > { %2134 = vtanh.f32 %v1071_v48  ;;  %v1075_v0 = vmul.f32 0.5, %v1026_v61  ;;  %v1080_v58 = vmul.f32 0.5, %v1067_v22 }
 0x222   : > { %v1028_v1 = vpop.f32.mrf.mxu0  ;;  %v1069_v2 = vpop.f32.mrf.mxu1 }
 0x223   : > { %2136 = vtanh.f32 %v1075_v0 }
 0x224   : > { %2138 = vtanh.f32 %v1065_v57 }
 0x225   : > { %2140 = vtanh.f32 %v1080_v58 }
 0x22e   : > { %v2135_v5 = vpop.eup %2134 }
 0x22f   : > { %v1073_v11 = vmul.f32 0.5, %v2135_v5 }
 0x230   : > { %v2137_v7 = vpop.eup %2136 }
 0x231   : > { %v1074_v59 = vadd.f32 0.5, %v1073_v11  ;;  %v1077_v45 = vmul.f32 0.5, %v2137_v7  ;;  %v2139_v23 = vpop.eup %2138 }
 0x232   : > { %v2141_v14 = vpop.eup %2140 }
 0x233   : > { %v1078_v62 = vadd.f32 0.5, %v1077_v45  ;;  %v1085_v8 = vmul.f32 %v2139_v23, %v1074_v59  ;;  %v1082_v33 = vmul.f32 0.5, %v2141_v14 }
 0x235   : > { %v1084_v12 = vmul.f32 %v1078_v62, %v2893_v4  ;;  %v1083_v26 = vadd.f32 0.5, %v1082_v33 }
 0x237   : > { %v2936_v6 = vadd.f32 %v1085_v8, %v1084_v12 }
 0x239   : > { %2142 = vtanh.f32 %v2936_v6 }
 0x246   : > { %v2143_v3 = vpop.eup %2142 }
 0x247   : > { %v1088_v10 = vmul.f32 %v2143_v3, %v1083_v26 }
 0x249   : > { %1978 = vst [vmem:[%s2545_s22 + $0x8] sm:$0xff] %v1088_v10  ;;  %v1091_v48 = vpack.c.bf16 %v1088_v10, %v1088_v10 }
 0x24b   : > { %1130 = vmatmul.mubr.bf16.vlgmr.msra.gmra.mxu0 %v1091_v48  ;;  %1171 = vmatmul.mubr.bf16.vlgmr.msra.gmra.mxu1 %v1091_v48 }
 0x24c   : > { %1206 = vmatpush1.bf16.msra.mxu0 %v2565_v16  ;;  %1247 = vmatpush1.bf16.msra.mxu1 %v2570_v17 }
 0x24d   : > { %1207 = vmatprep.subr.bf16.mxu0 %v2577_v18  ;;  %1248 = vmatprep.subr.bf16.mxu1 %v2582_v19 }
 0x24e   : > { %1237 = vmatprep.mubr.bf16.mxu0 %v3354_v63  ;;  %1278 = vmatprep.mubr.bf16.mxu1 %v3354_v63 }
 0x250   : > { %1208 = vmatpush1.bf16.msra.mxu0 %v2587_v20  ;;  %1249 = vmatpush1.bf16.msra.mxu1 %v2594_v21 }
 0x251   : > { %1209 = vmatprep.subr.bf16.mxu0 %v2603_v24  ;;  %1250 = vmatprep.subr.bf16.mxu1 %v2610_v25 }
 0x254   : > { %1210 = vmatpush1.bf16.msra.mxu0 %v2619_v27  ;;  %1251 = vmatpush1.bf16.msra.mxu1 %v2624_v28 }
 0x255   : > { %1211 = vmatprep.subr.bf16.mxu0 %v2631_v29  ;;  %1252 = vmatprep.subr.bf16.mxu1 %v2636_v30 }
 0x258   : > { %1212 = vmatpush1.bf16.msra.mxu0 %v2641_v31  ;;  %1253 = vmatpush1.bf16.msra.mxu1 %v2646_v32 }
 0x259   : > { %1213 = vmatprep.subr.bf16.mxu0 %v2657_v35  ;;  %1254 = vmatprep.subr.bf16.mxu1 %v2664_v36 }
 0x25c   : > { %1214 = vmatpush1.bf16.msra.mxu0 %v2671_v38  ;;  %1255 = vmatpush1.bf16.msra.mxu1 %v2676_v39 }
 0x25d   : > { %1215 = vmatprep.subr.bf16.mxu0 %v2683_v40  ;;  %1256 = vmatprep.subr.bf16.mxu1 %v2690_v41 }
 0x260   : > { %1216 = vmatpush1.bf16.msra.mxu0 %v2695_v42  ;;  %1257 = vmatpush1.bf16.msra.mxu1 %v2702_v43 }
 0x261   : > { %1217 = vmatprep.subr.bf16.mxu0 %v2713_v46  ;;  %1258 = vmatprep.subr.bf16.mxu1 %v2718_v47 }
 0x264   : > { %1218 = vmatpush1.bf16.msra.mxu0 %v2727_v49  ;;  %1259 = vmatpush1.bf16.msra.mxu1 %v2732_v50 }
 0x265   : > { %1219 = vmatprep.subr.bf16.mxu0 %v2739_v51  ;;  %1260 = vmatprep.subr.bf16.mxu1 %v2744_v52 }
 0x268   : > { %1220 = vmatpush1.bf16.msra.mxu0 %v2753_v53  ;;  %1261 = vmatpush1.bf16.msra.mxu1 %v2758_v54 }
 0x269   : > { %1313 = vmatprep.subr.bf16.mxu0 %v2555_v13  ;;  %1354 = vmatprep.subr.bf16.mxu1 %v2560_v15 }
 0x30b   : > { %v1131_v4 = vpop.f32.mrf.mxu0  ;;  %v1172_v61 = vpop.f32.mrf.mxu1 }
 0x30c   : > { %v1132_v60 = vadd.f32 %v1131_v4, %v2827_v37  ;;  %v1173_v58 = vadd.f32 %v1172_v61, %v2830_v44 }
 0x30d   : > { %v1133_v9 = vpop.f32.mrf.mxu0  ;;  %v1174_v57 = vpop.f32.mrf.mxu1 }
 0x30e   : > { %v1179_v0 = vmul.f32 0.5, %v1132_v60  ;;  %v1134_v1 = vadd.f32 %v1133_v9, %v2832_v55  ;;  %v1175_v59 = vadd.f32 %v1174_v57, %v2835_v56  ;;  %v3355_v9 = vld [vmem:[#allocation18_spill] sm:$0xff] }
 0x30f   : > { %v1135_v2 = vpop.f32.mrf.mxu0  ;;  %v1176_v22 = vpop.f32.mrf.mxu1 }
 0x310   : > { %2144 = vtanh.f32 %v1179_v0  ;;  %v1183_v5 = vmul.f32 0.5, %v1134_v1  ;;  %v1188_v45 = vmul.f32 0.5, %v1175_v59  ;;  %v3356_v22 = vld [vmem:[#allocation20_spill] sm:$0xff] }
 0x311   : > { %v1136_v11 = vpop.f32.mrf.mxu0  ;;  %v1177_v7 = vpop.f32.mrf.mxu1 }
 0x312   : > { %2146 = vtanh.f32 %v1183_v5  ;;  %v3357_v7 = vld [vmem:[#allocation19_spill] sm:$0xff] }
 0x313   : > { %2148 = vtanh.f32 %v1173_v58 }
 0x314   : > { %2150 = vtanh.f32 %v1188_v45 }
 0x31d   : > { %v2145_v23 = vpop.eup %2144 }
 0x31e   : > { %v1181_v37 = vmul.f32 0.5, %v2145_v23 }
 0x31f   : > { %v2147_v62 = vpop.eup %2146 }
 0x320   : > { %v1182_v8 = vadd.f32 0.5, %v1181_v37  ;;  %v1185_v12 = vmul.f32 0.5, %v2147_v62  ;;  %v2149_v55 = vpop.eup %2148 }
 0x321   : > { %v2151_v3 = vpop.eup %2150 }
 0x322   : > { %v1186_v14 = vadd.f32 0.5, %v1185_v12  ;;  %v1193_v33 = vmul.f32 %v2149_v55, %v1182_v8  ;;  %v1190_v10 = vmul.f32 0.5, %v2151_v3 }
 0x324   : > { %v1192_v44 = vmul.f32 %v1186_v14, %v2936_v6  ;;  %v1191_v56 = vadd.f32 0.5, %v1190_v10 }
 0x326   : > { %v2979_v26 = vadd.f32 %v1193_v33, %v1192_v44 }
 0x328   : > { %2152 = vtanh.f32 %v2979_v26 }
 0x335   : > { %v2153_v48 = vpop.eup %2152 }
 0x336   : > { %v1196_v4 = vmul.f32 %v2153_v48, %v1191_v56 }
 0x338   : > { %1979 = vst [vmem:[%s2545_s22 + $0x10] sm:$0xff] %v1196_v4  ;;  %v1199_v61 = vpack.c.bf16 %v1196_v4, %v1196_v4 }
 0x33a   : > { %1238 = vmatmul.mubr.bf16.vlgmr.msra.gmra.mxu0 %v1199_v61  ;;  %1279 = vmatmul.mubr.bf16.vlgmr.msra.gmra.mxu1 %v1199_v61 }
 0x33b   : > { %1314 = vmatpush1.bf16.msra.mxu0 %v2565_v16  ;;  %1355 = vmatpush1.bf16.msra.mxu1 %v2570_v17 }
 0x33c   : > { %1315 = vmatprep.subr.bf16.mxu0 %v2577_v18  ;;  %1356 = vmatprep.subr.bf16.mxu1 %v2582_v19 }
 0x33d   : > { %1345 = vmatprep.mubr.bf16.mxu0 %v3354_v63  ;;  %1386 = vmatprep.mubr.bf16.mxu1 %v3354_v63 }
 0x33f   : > { %1316 = vmatpush1.bf16.msra.mxu0 %v2587_v20  ;;  %1357 = vmatpush1.bf16.msra.mxu1 %v2594_v21 }
 0x340   : > { %1317 = vmatprep.subr.bf16.mxu0 %v2603_v24  ;;  %1358 = vmatprep.subr.bf16.mxu1 %v2610_v25 }
 0x343   : > { %1318 = vmatpush1.bf16.msra.mxu0 %v2619_v27  ;;  %1359 = vmatpush1.bf16.msra.mxu1 %v2624_v28 }
 0x344   : > { %1319 = vmatprep.subr.bf16.mxu0 %v2631_v29  ;;  %1360 = vmatprep.subr.bf16.mxu1 %v2636_v30 }
 0x347   : > { %1320 = vmatpush1.bf16.msra.mxu0 %v2641_v31  ;;  %1361 = vmatpush1.bf16.msra.mxu1 %v2646_v32 }
 0x348   : > { %1321 = vmatprep.subr.bf16.mxu0 %v2657_v35  ;;  %1362 = vmatprep.subr.bf16.mxu1 %v2664_v36 }
 0x34b   : > { %1322 = vmatpush1.bf16.msra.mxu0 %v2671_v38  ;;  %1363 = vmatpush1.bf16.msra.mxu1 %v2676_v39 }
 0x34c   : > { %1323 = vmatprep.subr.bf16.mxu0 %v2683_v40  ;;  %1364 = vmatprep.subr.bf16.mxu1 %v2690_v41 }
 0x34f   : > { %1324 = vmatpush1.bf16.msra.mxu0 %v2695_v42  ;;  %1365 = vmatpush1.bf16.msra.mxu1 %v2702_v43 }
 0x350   : > { %1325 = vmatprep.subr.bf16.mxu0 %v2713_v46  ;;  %1366 = vmatprep.subr.bf16.mxu1 %v2718_v47 }
 0x353   : > { %1326 = vmatpush1.bf16.msra.mxu0 %v2727_v49  ;;  %1367 = vmatpush1.bf16.msra.mxu1 %v2732_v50 }
 0x354   : > { %1327 = vmatprep.subr.bf16.mxu0 %v2739_v51  ;;  %1368 = vmatprep.subr.bf16.mxu1 %v2744_v52 }
 0x357   : > { %1328 = vmatpush1.bf16.msra.mxu0 %v2753_v53  ;;  %1369 = vmatpush1.bf16.msra.mxu1 %v2758_v54 }
 0x358   : > { %1421 = vmatprep.subr.bf16.mxu0 %v2555_v13  ;;  %1462 = vmatprep.subr.bf16.mxu1 %v2560_v15  ;;  %v3358_v13 = vld [vmem:[#allocation21_spill] sm:$0xff] }
 0x3fa   : > { %v1239_v6 = vpop.f32.mrf.mxu0  ;;  %v1280_v60 = vpop.f32.mrf.mxu1 }
 0x3fb   : > { %v1240_v57 = vadd.f32 %v1239_v6, %v3355_v9  ;;  %v1281_v59 = vadd.f32 %v1280_v60, %v3357_v7 }
 0x3fc   : > { %v1241_v0 = vpop.f32.mrf.mxu0  ;;  %v1282_v1 = vpop.f32.mrf.mxu1 }
 0x3fd   : > { %v1287_v2 = vmul.f32 0.5, %v1240_v57  ;;  %v1242_v58 = vadd.f32 %v1241_v0, %v3356_v22  ;;  %v1283_v15 = vadd.f32 %v1282_v1, %v3358_v13 }
 0x3fe   : > { %v1243_v5 = vpop.f32.mrf.mxu0  ;;  %v1284_v11 = vpop.f32.mrf.mxu1 }
 0x3ff   : > { %2154 = vtanh.f32 %v1287_v2  ;;  %v1291_v45 = vmul.f32 0.5, %v1242_v58  ;;  %v1296_v62 = vmul.f32 0.5, %v1283_v15 }
 0x400   : > { %v1244_v23 = vpop.f32.mrf.mxu0  ;;  %v1285_v37 = vpop.f32.mrf.mxu1 }
 0x401   : > { %2156 = vtanh.f32 %v1291_v45 }
 0x402   : > { %2158 = vtanh.f32 %v1281_v59 }
 0x403   : > { %2160 = vtanh.f32 %v1296_v62 }
 0x40c   : > { %v2155_v8 = vpop.eup %2154 }
 0x40d   : > { %v1289_v12 = vmul.f32 0.5, %v2155_v8 }
 0x40e   : > { %v2157_v55 = vpop.eup %2156 }
 0x40f   : > { %v1290_v14 = vadd.f32 0.5, %v1289_v12  ;;  %v1293_v33 = vmul.f32 0.5, %v2157_v55  ;;  %v2159_v44 = vpop.eup %2158  ;;  %v3082_v55 = vld [vmem:[%s3322_s2 + $0xe0] ss:$16 sps:$4 sm:$0xff]  }
 0x410   : > { %v2161_v4 = vpop.eup %2160 }
 0x411   : > { %v1294_v3 = vadd.f32 0.5, %v1293_v33  ;;  %v1301_v10 = vmul.f32 %v2159_v44, %v1290_v14  ;;  %v1298_v61 = vmul.f32 0.5, %v2161_v4  ;;  %v3088_v14 = vld [vmem:[%s3322_s2 + $0xe8] ss:$16 sps:$4 sm:$0xff]   ;;  %v3094_v33 = vld [vmem:[%s3322_s2 + $0xc4] ss:$16 sps:$4 sm:$0xff]  }
 0x412   : > { %v3100_v44 = vld [vmem:[%s3322_s2 + $0xcc] ss:$16 sps:$4 sm:$0xff]   ;;  %v3132_v4 = vld [vmem:[%s3322_s2 + $0xa0] ss:$16 sps:$4 sm:$0xff]  }
 0x413   : > { %v1300_v56 = vmul.f32 %v1294_v3, %v2979_v26  ;;  %v1299_v6 = vadd.f32 0.5, %v1298_v61  ;;  %v3108_v3 = vld [vmem:[%s3322_s2 + $0xc0] ss:$16 sps:$4 sm:$0xff]   ;;  %v3138_v61 = vld [vmem:[%s3322_s2 + $0xa8] ss:$16 sps:$4 sm:$0xff]  }
 0x415   : > { %v3022_v48 = vadd.f32 %v1301_v10, %v1300_v56  ;;  %v3114_v10 = vld [vmem:[%s3322_s2 + $0xc8] ss:$16 sps:$4 sm:$0xff]   ;;  %v3120_v56 = vld [vmem:[%s3322_s2 + $0xa4] ss:$16 sps:$4 sm:$0xff]  }
 0x417   : > { %2162 = vtanh.f32 %v3022_v48 }
 0x424   : > { %v2163_v60 = vpop.eup %2162 }
 0x425   : > { %v1304_v9 = vmul.f32 %v2163_v60, %v1299_v6  ;;  %v3144_v6 = vld [vmem:[%s3322_s2 + $0x84] ss:$16 sps:$4 sm:$0xff]   ;;  %v3150_v60 = vld [vmem:[%s3322_s2 + $0x8c] ss:$16 sps:$4 sm:$0xff]  }
 0x427   : > { %1980 = vst [vmem:[%s2545_s22 + $0x18] sm:$0xff] %v1304_v9  ;;  %v1307_v57 = vpack.c.bf16 %v1304_v9, %v1304_v9  ;;  %v3156_v9 = vld [vmem:[%s3322_s2 + $0x80] ss:$16 sps:$4 sm:$0xff]  }
 0x429   : > { %1346 = vmatmul.mubr.bf16.vlgmr.msra.gmra.mxu0 %v1307_v57  ;;  %1387 = vmatmul.mubr.bf16.vlgmr.msra.gmra.mxu1 %v1307_v57  ;;  %v3162_v57 = vld [vmem:[%s3322_s2 + $0x88] ss:$16 sps:$4 sm:$0xff]  }
 0x42a   : > { %1422 = vmatpush1.bf16.msra.mxu0 %v2565_v16  ;;  %1463 = vmatpush1.bf16.msra.mxu1 %v2570_v17  ;;  %v3061_v16 = vld [vmem:[%s3322_s2 + $0xe4] ss:$16 sps:$4 sm:$0xff]   ;;  %v3067_v17 = vld [vmem:[%s3322_s2 + $0xec] ss:$16 sps:$4 sm:$0xff]  }
 0x42b   : > { %1423 = vmatprep.subr.bf16.mxu0 %v2577_v18  ;;  %1464 = vmatprep.subr.bf16.mxu1 %v2582_v19 }
 0x42c   : > { %1453 = vmatprep.mubr.bf16.mxu0 %v3354_v63  ;;  %1494 = vmatprep.mubr.bf16.mxu1 %v3354_v63 }
 0x42e   : > { %1424 = vmatpush1.bf16.msra.mxu0 %v2587_v20  ;;  %1465 = vmatpush1.bf16.msra.mxu1 %v2594_v21  ;;  %v3359_v20 = vld [vmem:[#allocation22_spill] sm:$0xff] }
 0x42f   : > { %1425 = vmatprep.subr.bf16.mxu0 %v2603_v24  ;;  %1466 = vmatprep.subr.bf16.mxu1 %v2610_v25 }
 0x432   : > { %1426 = vmatpush1.bf16.msra.mxu0 %v2619_v27  ;;  %1467 = vmatpush1.bf16.msra.mxu1 %v2624_v28  ;;  %v3360_v28 = vld [vmem:[#allocation24_spill] sm:$0xff] }
 0x433   : > { %1427 = vmatprep.subr.bf16.mxu0 %v2631_v29  ;;  %1468 = vmatprep.subr.bf16.mxu1 %v2636_v30 }
 0x436   : > { %1428 = vmatpush1.bf16.msra.mxu0 %v2641_v31  ;;  %1469 = vmatpush1.bf16.msra.mxu1 %v2646_v32  ;;  %v3361_v32 = vld [vmem:[#allocation23_spill] sm:$0xff] }
 0x437   : > { %1429 = vmatprep.subr.bf16.mxu0 %v2657_v35  ;;  %1470 = vmatprep.subr.bf16.mxu1 %v2664_v36 }
 0x43a   : > { %1430 = vmatpush1.bf16.msra.mxu0 %v2671_v38  ;;  %1471 = vmatpush1.bf16.msra.mxu1 %v2676_v39 }
 0x43b   : > { %1431 = vmatprep.subr.bf16.mxu0 %v2683_v40  ;;  %1472 = vmatprep.subr.bf16.mxu1 %v2690_v41  ;;  %v3362_v40 = vld [vmem:[#allocation25_spill] sm:$0xff] }
 0x43e   : > { %1432 = vmatpush1.bf16.msra.mxu0 %v2695_v42  ;;  %1473 = vmatpush1.bf16.msra.mxu1 %v2702_v43 }
 0x43f   : > { %1433 = vmatprep.subr.bf16.mxu0 %v2713_v46  ;;  %1474 = vmatprep.subr.bf16.mxu1 %v2718_v47 }
 0x442   : > { %1434 = vmatpush1.bf16.msra.mxu0 %v2727_v49  ;;  %1475 = vmatpush1.bf16.msra.mxu1 %v2732_v50 }
 0x443   : > { %1435 = vmatprep.subr.bf16.mxu0 %v2739_v51  ;;  %1476 = vmatprep.subr.bf16.mxu1 %v2744_v52 }
 0x446   : > { %1436 = vmatpush1.bf16.msra.mxu0 %v2753_v53  ;;  %1477 = vmatpush1.bf16.msra.mxu1 %v2758_v54 }
 0x447   : > { %1529 = vmatprep.subr.bf16.mxu0 %v3061_v16  ;;  %1570 = vmatprep.subr.bf16.mxu1 %v3067_v17 }
 0x4e9   : > { %v1347_v18 = vpop.f32.mrf.mxu0  ;;  %v1388_v19 = vpop.f32.mrf.mxu1 }
 0x4ea   : > { %v1348_v21 = vadd.f32 %v1347_v18, %v3359_v20  ;;  %v1389_v35 = vadd.f32 %v1388_v19, %v3361_v32  ;;  %v3168_v18 = vld [vmem:[%s3322_s2 + $0x64] ss:$16 sps:$4 sm:$0xff]   ;;  %v3174_v19 = vld [vmem:[%s3322_s2 + $0x6c] ss:$16 sps:$4 sm:$0xff]   ;;  %v3180_v20 = vld [vmem:[%s3322_s2 + $0x60] ss:$16 sps:$4 sm:$0xff]  }
 0x4eb   : > { %v1349_v24 = vpop.f32.mrf.mxu0  ;;  %v1390_v25 = vpop.f32.mrf.mxu1 }
 0x4ec   : > { %v1395_v27 = vmul.f32 0.5, %v1348_v21  ;;  %v1350_v29 = vadd.f32 %v1349_v24, %v3360_v28  ;;  %v1391_v26 = vadd.f32 %v1390_v25, %v3362_v40  ;;  %v3186_v21 = vld [vmem:[%s3322_s2 + $0x68] ss:$16 sps:$4 sm:$0xff]   ;;  %v3192_v24 = vld [vmem:[%s3322_s2 + $0x44] ss:$16 sps:$4 sm:$0xff]  }
 0x4ed   : > { %v1351_v30 = vpop.f32.mrf.mxu0  ;;  %v1392_v31 = vpop.f32.mrf.mxu1 }
 0x4ee   : > { %2164 = vtanh.f32 %v1395_v27  ;;  %v1399_v36 = vmul.f32 0.5, %v1350_v29  ;;  %v1404_v0 = vmul.f32 0.5, %v1391_v26 }
 0x4ef   : > { %v1352_v38 = vpop.f32.mrf.mxu0  ;;  %v1393_v39 = vpop.f32.mrf.mxu1 }
 0x4f0   : > { %2166 = vtanh.f32 %v1399_v36 }
 0x4f1   : > { %2168 = vtanh.f32 %v1389_v35 }
 0x4f2   : > { %2170 = vtanh.f32 %v1404_v0 }
 0x4fb   : > { %v2165_v1 = vpop.eup %2164 }
 0x4fc   : > { %v1397_v2 = vmul.f32 0.5, %v2165_v1 }
 0x4fd   : > { %v2167_v22 = vpop.eup %2166 }
 0x4fe   : > { %v1398_v58 = vadd.f32 0.5, %v1397_v2  ;;  %v1401_v5 = vmul.f32 0.5, %v2167_v22  ;;  %v2169_v11 = vpop.eup %2168 }
 0x4ff   : > { %v2171_v37 = vpop.eup %2170 }
 0x500   : > { %v1402_v7 = vadd.f32 0.5, %v1401_v5  ;;  %v1409_v59 = vmul.f32 %v2169_v11, %v1398_v58  ;;  %v1406_v13 = vmul.f32 0.5, %v2171_v37  ;;  %v2228_v37 = vld [vmem:[%s3322_s2 + $0x24] ss:$16 sps:$4 sm:$0xff]  }
 0x502   : > { %v1408_v45 = vmul.f32 %v1402_v7, %v3022_v48  ;;  %v1407_v15 = vadd.f32 0.5, %v1406_v13  ;;  %v3126_v48 = vld [vmem:[%s3322_s2 + $0xac] ss:$16 sps:$4 sm:$0xff]  }
 0x503   : > { %v2229_v13 = vld [vmem:[%s3322_s2 + $0x2c] ss:$16 sps:$4 sm:$0xff]  }
 0x504   : > { %v3075_v23 = vadd.f32 %v1409_v59, %v1408_v45  ;;  %v2226_v45 = vld [vmem:[%s3322_s2 + $0x40] ss:$16 sps:$4 sm:$0xff]  }
 0x506   : > { %2172 = vtanh.f32 %v3075_v23 }
 0x513   : > { %v2173_v62 = vpop.eup %2172 }
 0x514   : > { %v1412_v8 = vmul.f32 %v2173_v62, %v1407_v15  ;;  %v2230_v15 = vld [vmem:[%s3322_s2 + $0x20] ss:$16 sps:$4 sm:$0xff]   ;;  %v2231_v62 = vld [vmem:[%s3322_s2 + $0x28] ss:$16 sps:$4 sm:$0xff]  }
 0x516   : > { %1981 = vst [vmem:[%s2545_s22 + $0x20] sm:$0xff] %v1412_v8  ;;  %v1415_v12 = vpack.c.bf16 %v1412_v8, %v1412_v8  ;;  %v2232_v8 = vld [vmem:[%s3322_s2 + $0x4] ss:$16 sps:$4 sm:$0xff]  }
 0x518   : > { %1454 = vmatmul.mubr.bf16.vlgmr.msra.gmra.mxu0 %v1415_v12  ;;  %1495 = vmatmul.mubr.bf16.vlgmr.msra.gmra.mxu1 %v1415_v12  ;;  %v2233_v12 = vld [vmem:[%s3322_s2 + $0xc] ss:$16 sps:$4 sm:$0xff]  }
 0x519   : > { %1530 = vmatpush1.bf16.msra.mxu0 %v3082_v55  ;;  %1571 = vmatpush1.bf16.msra.mxu1 %v3088_v14 }
 0x51a   : > { %1531 = vmatprep.subr.bf16.mxu0 %v3094_v33  ;;  %1572 = vmatprep.subr.bf16.mxu1 %v3100_v44 }
 0x51b   : > { %1561 = vmatprep.mubr.bf16.mxu0 %v3354_v63  ;;  %1602 = vmatprep.mubr.bf16.mxu1 %v3354_v63 }
 0x51d   : > { %1532 = vmatpush1.bf16.msra.mxu0 %v3108_v3  ;;  %1573 = vmatpush1.bf16.msra.mxu1 %v3114_v10 }
 0x51e   : > { %1533 = vmatprep.subr.bf16.mxu0 %v3120_v56  ;;  %1574 = vmatprep.subr.bf16.mxu1 %v3126_v48 }
 0x521   : > { %1534 = vmatpush1.bf16.msra.mxu0 %v3132_v4  ;;  %1575 = vmatpush1.bf16.msra.mxu1 %v3138_v61 }
 0x522   : > { %1535 = vmatprep.subr.bf16.mxu0 %v3144_v6  ;;  %1576 = vmatprep.subr.bf16.mxu1 %v3150_v60 }
 0x525   : > { %1536 = vmatpush1.bf16.msra.mxu0 %v3156_v9  ;;  %1577 = vmatpush1.bf16.msra.mxu1 %v3162_v57 }
 0x526   : > { %1537 = vmatprep.subr.bf16.mxu0 %v3168_v18  ;;  %1578 = vmatprep.subr.bf16.mxu1 %v3174_v19 }
 0x529   : > { %1538 = vmatpush1.bf16.msra.mxu0 %v3180_v20  ;;  %1579 = vmatpush1.bf16.msra.mxu1 %v3186_v21 }
 0x52a   : > { %1539 = vmatprep.subr.bf16.mxu0 %v3192_v24  ;;  %1580 = vmatprep.subr.bf16.mxu1 %v2690_v41 }
 0x52d   : > { %1540 = vmatpush1.bf16.msra.mxu0 %v2695_v42  ;;  %1581 = vmatpush1.bf16.msra.mxu1 %v2702_v43  ;;  %v3363_v43 = vld [vmem:[#allocation26_spill] sm:$0xff] }
 0x52e   : > { %1541 = vmatprep.subr.bf16.mxu0 %v2713_v46  ;;  %1582 = vmatprep.subr.bf16.mxu1 %v2718_v47 }
 0x531   : > { %1542 = vmatpush1.bf16.msra.mxu0 %v2727_v49  ;;  %1583 = vmatpush1.bf16.msra.mxu1 %v2732_v50  ;;  %v3364_v50 = vld [vmem:[#allocation28_spill] sm:$0xff] }
 0x532   : > { %1543 = vmatprep.subr.bf16.mxu0 %v2739_v51  ;;  %1584 = vmatprep.subr.bf16.mxu1 %v2744_v52  ;;  %v3365_v52 = vld [vmem:[#allocation27_spill] sm:$0xff] }
 0x535   : > { %1544 = vmatpush1.bf16.msra.mxu0 %v2753_v53  ;;  %1585 = vmatpush1.bf16.msra.mxu1 %v2758_v54 }
 0x536   : > { %1637 = vmatprep.subr.bf16.mxu0 %v3061_v16  ;;  %1678 = vmatprep.subr.bf16.mxu1 %v3067_v17  ;;  %v3366_v16 = vld [vmem:[#allocation29_spill] sm:$0xff] }
 0x5d8   : > { %v1455_v41 = vpop.f32.mrf.mxu0  ;;  %v1496_v42 = vpop.f32.mrf.mxu1 }
 0x5d9   : > { %v1456_v46 = vadd.f32 %v1455_v41, %v3363_v43  ;;  %v1497_v53 = vadd.f32 %v1496_v42, %v3365_v52 }
 0x5da   : > { %v1457_v47 = vpop.f32.mrf.mxu0  ;;  %v1498_v49 = vpop.f32.mrf.mxu1 }
 0x5db   : > { %v1503_v25 = vmul.f32 0.5, %v1456_v46  ;;  %v1458_v27 = vadd.f32 %v1457_v47, %v3364_v50  ;;  %v1499_v17 = vadd.f32 %v1498_v49, %v3366_v16 }
 0x5dc   : > { %v1459_v51 = vpop.f32.mrf.mxu0  ;;  %v1500_v28 = vpop.f32.mrf.mxu1 }
 0x5dd   : > { %2174 = vtanh.f32 %v1503_v25  ;;  %v1507_v29 = vmul.f32 0.5, %v1458_v27  ;;  %v1512_v31 = vmul.f32 0.5, %v1499_v17 }
 0x5de   : > { %v1460_v54 = vpop.f32.mrf.mxu0  ;;  %v1501_v30 = vpop.f32.mrf.mxu1 }
 0x5df   : > { %2176 = vtanh.f32 %v1507_v29 }
 0x5e0   : > { %2178 = vtanh.f32 %v1497_v53 }
 0x5e1   : > { %2180 = vtanh.f32 %v1512_v31 }
 0x5ea   : > { %v2175_v32 = vpop.eup %2174 }
 0x5eb   : > { %v1505_v35 = vmul.f32 0.5, %v2175_v32 }
 0x5ec   : > { %v2177_v36 = vpop.eup %2176 }
 0x5ed   : > { %v1506_v38 = vadd.f32 0.5, %v1505_v35  ;;  %v1509_v39 = vmul.f32 0.5, %v2177_v36  ;;  %v2179_v40 = vpop.eup %2178  ;;  %v3371_v35 = vld [vmem:[#allocation34_spill] sm:$0xff] }
 0x5ee   : > { %v2181_v22 = vpop.eup %2180 }
 0x5ef   : > { %v1510_v26 = vadd.f32 0.5, %v1509_v39  ;;  %v1517_v0 = vmul.f32 %v2179_v40, %v1506_v38  ;;  %v1514_v58 = vmul.f32 0.5, %v2181_v22 }
 0x5f1   : > { %v1516_v1 = vmul.f32 %v1510_v26, %v3075_v23  ;;  %v1515_v5 = vadd.f32 0.5, %v1514_v58  ;;  %v2227_v23 = vld [vmem:[%s3322_s2 + $0x48] ss:$16 sps:$4 sm:$0xff]  }
 0x5f3   : > { %v3213_v2 = vadd.f32 %v1517_v0, %v1516_v1 }
 0x5f5   : > { %2182 = vtanh.f32 %v3213_v2 }
 0x602   : > { %v2183_v11 = vpop.eup %2182 }
 0x603   : > { %v1520_v7 = vmul.f32 %v2183_v11, %v1515_v5 }
 0x605   : > { %1982 = vst [vmem:[%s2545_s22 + $0x28] sm:$0xff] %v1520_v7  ;;  %v1523_v59 = vpack.c.bf16 %v1520_v7, %v1520_v7  ;;  %v3373_v7 = vld [vmem:[#allocation36_spill] sm:$0xff] }
 0x607   : > { %1562 = vmatmul.mubr.bf16.vlgmr.msra.gmra.mxu0 %v1523_v59  ;;  %1603 = vmatmul.mubr.bf16.vlgmr.msra.gmra.mxu1 %v1523_v59 }
 0x608   : > { %1638 = vmatpush1.bf16.msra.mxu0 %v3082_v55  ;;  %1679 = vmatpush1.bf16.msra.mxu1 %v3088_v14  ;;  %v2234_v55 = vld [vmem:[%s3322_s2] ss:$16 sps:$4 sm:$0xff]   ;;  %v2235_v14 = vld [vmem:[%s3322_s2 + $0x8] ss:$16 sps:$4 sm:$0xff]  }
 0x609   : > { %1639 = vmatprep.subr.bf16.mxu0 %v3094_v33  ;;  %1680 = vmatprep.subr.bf16.mxu1 %v3100_v44 }
 0x60a   : > { %1669 = vmatprep.mubr.bf16.mxu0 %v3354_v63  ;;  %1710 = vmatprep.mubr.bf16.mxu1 %v3354_v63  ;;  %v2225_v63 = vld [vmem:[%s3322_s2 + $0x4c] ss:$16 sps:$4 sm:$0xff]  }
 0x60c   : > { %1640 = vmatpush1.bf16.msra.mxu0 %v3108_v3  ;;  %1681 = vmatpush1.bf16.msra.mxu1 %v3114_v10  ;;  %v3367_v3 = vld [vmem:[#allocation30_spill] sm:$0xff] }
 0x60d   : > { %1641 = vmatprep.subr.bf16.mxu0 %v3120_v56  ;;  %1682 = vmatprep.subr.bf16.mxu1 %v3126_v48 }
 0x610   : > { %1642 = vmatpush1.bf16.msra.mxu0 %v3132_v4  ;;  %1683 = vmatpush1.bf16.msra.mxu1 %v3138_v61  ;;  %v3368_v61 = vld [vmem:[#allocation32_spill] sm:$0xff] }
 0x611   : > { %1643 = vmatprep.subr.bf16.mxu0 %v3144_v6  ;;  %1684 = vmatprep.subr.bf16.mxu1 %v3150_v60 }
 0x614   : > { %1644 = vmatpush1.bf16.msra.mxu0 %v3156_v9  ;;  %1685 = vmatpush1.bf16.msra.mxu1 %v3162_v57  ;;  %v3369_v57 = vld [vmem:[#allocation31_spill] sm:$0xff] }
 0x615   : > { %1645 = vmatprep.subr.bf16.mxu0 %v3168_v18  ;;  %1686 = vmatprep.subr.bf16.mxu1 %v3174_v19 }
 0x618   : > { %1646 = vmatpush1.bf16.msra.mxu0 %v3180_v20  ;;  %1687 = vmatpush1.bf16.msra.mxu1 %v3186_v21 }
 0x619   : > { %1647 = vmatprep.subr.bf16.mxu0 %v3192_v24  ;;  %1688 = vmatprep.subr.bf16.mxu1 %v2225_v63  ;;  %v3370_v24 = vld [vmem:[#allocation33_spill] sm:$0xff] }
 0x61c   : > { %1648 = vmatpush1.bf16.msra.mxu0 %v2226_v45  ;;  %1689 = vmatpush1.bf16.msra.mxu1 %v2227_v23 }
 0x61d   : > { %1649 = vmatprep.subr.bf16.mxu0 %v2228_v37  ;;  %1690 = vmatprep.subr.bf16.mxu1 %v2229_v13 }
 0x620   : > { %1650 = vmatpush1.bf16.msra.mxu0 %v2230_v15  ;;  %1691 = vmatpush1.bf16.msra.mxu1 %v2231_v62 }
 0x621   : > { %1651 = vmatprep.subr.bf16.mxu0 %v2232_v8  ;;  %1692 = vmatprep.subr.bf16.mxu1 %v2233_v12 }
 0x624   : > { %1652 = vmatpush1.bf16.msra.mxu0 %v2234_v55  ;;  %1693 = vmatpush1.bf16.msra.mxu1 %v2235_v14 }
 0x6c7   : > { %v1563_v33 = vpop.f32.mrf.mxu0  ;;  %v1604_v44 = vpop.f32.mrf.mxu1 }
 0x6c8   : > { %v1564_v10 = vadd.f32 %v1563_v33, %v3367_v3  ;;  %v1605_v18 = vadd.f32 %v1604_v44, %v3369_v57 }
 0x6c9   : > { %v1565_v56 = vpop.f32.mrf.mxu0  ;;  %v1606_v48 = vpop.f32.mrf.mxu1 }
 0x6ca   : > { %v1611_v4 = vmul.f32 0.5, %v1564_v10  ;;  %v1566_v6 = vadd.f32 %v1565_v56, %v3368_v61  ;;  %v1607_v41 = vadd.f32 %v1606_v48, %v3370_v24 }
 0x6cb   : > { %v1567_v60 = vpop.f32.mrf.mxu0  ;;  %v1608_v9 = vpop.f32.mrf.mxu1 }
 0x6cc   : > { %2184 = vtanh.f32 %v1611_v4  ;;  %v1615_v19 = vmul.f32 0.5, %v1566_v6  ;;  %v1620_v42 = vmul.f32 0.5, %v1607_v41 }
 0x6cd   : > { %v1568_v20 = vpop.f32.mrf.mxu0  ;;  %v1609_v21 = vpop.f32.mrf.mxu1 }
 0x6ce   : > { %2186 = vtanh.f32 %v1615_v19 }
 0x6cf   : > { %2188 = vtanh.f32 %v1605_v18 }
 0x6d0   : > { %2190 = vtanh.f32 %v1620_v42 }
 0x6d9   : > { %v2185_v43 = vpop.eup %2184 }
 0x6da   : > { %v1613_v46 = vmul.f32 0.5, %v2185_v43 }
 0x6db   : > { %v2187_v47 = vpop.eup %2186 }
 0x6dc   : > { %v1614_v49 = vadd.f32 0.5, %v1613_v46  ;;  %v1617_v25 = vmul.f32 0.5, %v2187_v47  ;;  %v2189_v50 = vpop.eup %2188 }
 0x6dd   : > { %v2191_v53 = vpop.eup %2190 }
 0x6de   : > { %v1618_v27 = vadd.f32 0.5, %v1617_v25  ;;  %v1625_v51 = vmul.f32 %v2189_v50, %v1614_v49  ;;  %v1622_v29 = vmul.f32 0.5, %v2191_v53 }
 0x6e0   : > { %v1624_v28 = vmul.f32 %v1618_v27, %v3213_v2  ;;  %v1623_v54 = vadd.f32 0.5, %v1622_v29  ;;  %v3372_v2 = vld [vmem:[#allocation35_spill] sm:$0xff] }
 0x6e2   : > { %v1626_v52 = vadd.f32 %v1625_v51, %v1624_v28 }
 0x6e4   : > { %2192 = vtanh.f32 %v1626_v52 }
 0x6f1   : > { %v2193_v30 = vpop.eup %2192 }
 0x6f2   : > { %v1628_v16 = vmul.f32 %v2193_v30, %v1623_v54 }
 0x6f4   : > { %1983 = vst [vmem:[%s2545_s22 + $0x30] sm:$0xff] %v1628_v16  ;;  %v1631_v17 = vpack.c.bf16 %v1628_v16, %v1628_v16 }
 0x6f6   : > { %1670 = vmatmul.mubr.bf16.vlgmr.msra.gmra.mxu0 %v1631_v17  ;;  %1711 = vmatmul.mubr.bf16.vlgmr.msra.gmra.mxu1 %v1631_v17 }
 0x7b6   : > { %v1671_v31 = vpop.f32.mrf.mxu0  ;;  %v1712_v32 = vpop.f32.mrf.mxu1 }
 0x7b7   : > { %v1672_v36 = vadd.f32 %v1671_v31, %v3371_v35  ;;  %v1713_v22 = vadd.f32 %v1712_v32, %v3372_v2 }
 0x7b8   : > { %v1673_v38 = vpop.f32.mrf.mxu0  ;;  %v1714_v39 = vpop.f32.mrf.mxu1 }
 0x7b9   : > { %v1719_v40 = vmul.f32 0.5, %v1672_v36  ;;  %v1674_v26 = vadd.f32 %v1673_v38, %v2883_v34  ;;  %v1715_v59 = vadd.f32 %v1714_v39, %v3373_v7 }
 0x7ba   : > { %v1675_v0 = vpop.f32.mrf.mxu0  ;;  %v1716_v1 = vpop.f32.mrf.mxu1 }
 0x7bb   : > { %2194 = vtanh.f32 %v1719_v40  ;;  %v1723_v58 = vmul.f32 0.5, %v1674_v26  ;;  %v1728_v63 = vmul.f32 0.5, %v1715_v59 }
 0x7bc   : > { %v1676_v5 = vpop.f32.mrf.mxu0  ;;  %v1717_v11 = vpop.f32.mrf.mxu1 }
 0x7bd   : > { %2196 = vtanh.f32 %v1723_v58 }
 0x7be   : > { %2198 = vtanh.f32 %v1713_v22 }
 0x7bf   : > { %2200 = vtanh.f32 %v1728_v63 }
 0x7c8   : > { %v2195_v45 = vpop.eup %2194 }
 0x7c9   : > { %v1721_v23 = vmul.f32 0.5, %v2195_v45 }
 0x7ca   : > { %v2197_v37 = vpop.eup %2196 }
 0x7cb   : > { %v1722_v13 = vadd.f32 0.5, %v1721_v23  ;;  %v1725_v15 = vmul.f32 0.5, %v2197_v37  ;;  %v2199_v34 = vpop.eup %2198 }
 0x7cc   : > { %v2201_v14 = vpop.eup %2200 }
 0x7cd   : > { %v1726_v62 = vadd.f32 0.5, %v1725_v15  ;;  %v1733_v8 = vmul.f32 %v2199_v34, %v1722_v13  ;;  %v1730_v33 = vmul.f32 0.5, %v2201_v14 }
 0x7cf   : > { %v1732_v12 = vmul.f32 %v1726_v62, %v1626_v52  ;;  %v1731_v44 = vadd.f32 0.5, %v1730_v33 }
 0x7d1   : > { %v1734_v55 = vadd.f32 %v1733_v8, %v1732_v12 }
 0x7d3   : > { %2202 = vtanh.f32 %v1734_v55  ;;  %1740 = vst [vmem:[#allocation4] sm:$0xff] %v1734_v55 }
 0x7df   : > { %1744 = sbr.rel (%p1985_p2) target bundleno = 2021 (0x7e5), region = 64 }
 0x7e0   : > { %v2203_v3 = vpop.eup %2202 }
 0x7e1   : > { %v1736_v10 = vmul.f32 %v2203_v3, %v1731_v44 }
 0x7e3   : > { %1984 = vst [vmem:[%s2545_s22 + $0x38] sm:$0xff] %v1736_v10  ;;  %1739 = vst [vmem:[#allocation3] sm:$0xff] %v1736_v10 }
 0x7e4   : > { %1745 = vst [vmem:[#allocation11] sm:$0xff] %v1736_v10  ;;  %1746 = vst [vmem:[#allocation12] sm:$0xff] %v1734_v55 }
 0x7e5 PF: > { %p3285_p5 = scmp.eq.s32.totalorder %s1914_s10, 1  ;;  %s2408_s9 = smov [#allocation11]  }
 0x7e6   : > { %s1768_s19 = sshll.u32 %s2408_s9, 4  ;;  %s2409_s15 = smov [#allocation12]   ;;  %s1769_s19 = int_to_ptr.vmem [resolvable:$true] %s1768_s19 }
 0x7e7   : > { %s1781_s16 = sshll.u32 %s2409_s15, 4  ;;  %s2314_s22 = scalar_lea.vmem %s1769_s19, 128  ;;  %s1782_s16 = int_to_ptr.vmem [resolvable:$true] %s1781_s16 }
 0x7e8   : > { %p2315_p10 = scmp.ne.s32.totalorder %s1769_s19, %s2314_s22  ;;  %p2321_p6 = scmp.lt.s32.totalorder %s1769_s19, %s1769_s19 }
 0x7e9   : > { %p2322_p13 = scmp.lt.s32.totalorder %s2314_s22, %s2314_s22 }
 0x7ea   : > { %p2316_p11 = pnand %p2315_p10, %p3285_p5 }
 0x7eb   : > { %p2323_p0 = por %p2322_p13, %p2321_p6 }
 0x7ec   : > { %p2317_p12 = pneg %p2316_p11 }
 0x7ee   : > { %p2324_p1 = pnand %p2323_p0, %p2317_p12 }
 0x7f0   : > { %2327 = shalt.err (!%p2324_p1)
}
 0x7f1   : > { %2005 = dma.vmem_to_hbm [thread:$0]  (%p3285_p5), %s1769_s19, 128, %s3327_s7, [#allocation7]  }
 0x7f2   : > { %s2338_s14 = scalar_lea.vmem %s1782_s16, 128  ;;  %p2345_p7 = scmp.lt.s32.totalorder %s1782_s16, %s1782_s16 }
 0x7f3   : > { %p2339_p4 = scmp.ne.s32.totalorder %s1782_s16, %s2338_s14  ;;  %p2346_p3 = scmp.lt.s32.totalorder %s2338_s14, %s2338_s14 }
 0x7f5   : > { %p2340_p8 = pnand %p2339_p4, %p3285_p5  ;;  %p2347_p2 = por %p2346_p3, %p2345_p7 }
 0x7f7   : > { %p2341_p9 = pneg %p2340_p8 }
 0x7f9   : > { %p2348_p10 = pnand %p2347_p2, %p2341_p9 }
 0x7fb   : > { %2351 = shalt.err (!%p2348_p10)
}
 0x7fc   : > { %2007 = dma.vmem_to_hbm [thread:$0]  (%p3285_p5), %s1782_s16, 128, %s3328_s8, [#allocation13]  }
 0x7fd   : > { %2383 = dma.done.wait (%p3285_p5), [#allocation7], 128  }
 0x7fe   : > { %2385 = vsyncadd (%p3285_p5), [#allocation7], 4294967168 }
 0x7ff   : > { %2387 = dma.done.wait (%p3285_p5), [#allocation13], 128  }
 0x800   : > { %2389 = vsyncadd (%p3285_p5), [#allocation13], 4294967168 }
 0x801 PF: > { %s23_s29 = sadd.s32 1, %s2400_s29   ;;  %s3375_s27 = smov %s2396_s28 }
 0x802   : > { %p20_p11 = scmp.ge.s32.totalorder %s23_s29, 4   ;;  %s3376_s28 = smov %s3378_s13 }
 0x804   :  { %22 = sbr.rel (!%p20_p11) target bundleno = 5 (0x5), region = 130 }
 0x809   :  { %1809 = vsyncpa [#allocation6], 1 }
 0x80a   :  { %1811 = vsyncpa [#allocation6 + $0x1], 1 }
 0x80b   :  { %1812 = vsyncpa [#allocation9], 1 }
 0x80c   :  { %1813 = vsyncpa [#allocation7], 1 }
 0x80d   :  { %1815 = vsyncpa [#allocation7 + $0x1], 1 }
 0x80e   :  { %1816 = vsyncpa [#allocation13], 1 }

</bundles_post_ra>
